<compile_context>
chip_gen: v6e
topology: v6e:2x2x1
jax: 0.10.0
libtpu: 0.0.40
codegen_flags: <defaults>
</compile_context>

<pallas_src>
import jax
import jax.numpy as jnp
from jax.experimental import pallas as pl
from jax.experimental.pallas import tpu as pltpu

# ---- config implied by the module ------------------------------------------
B = 2          # batch
N = 16         # args.nodes
S = 12         # args.LOOK_BACK (must be 12: prc is repeated x12 and stacked with occ)
KCNN = 2       # args.kcnn
SEQ = S - KCNN + 1   # conv output length along time

# coalesced SMEM parameter-vector layout
_OFF_WOCC = 0               # KCNN occ-channel conv taps
_OFF_W1SUM = KCNN           # sum of prc-channel conv taps (prc constant in time)
_OFF_CB = KCNN + 1          # conv bias
_OFF_WIH = KCNN + 2         # GRU W_ih (r, z, n)
_OFF_WHH = KCNN + 5         # GRU W_hh (r, z, n)
_OFF_BIH = KCNN + 8         # GRU b_ih (r, z, n), with GCN Linear bias folded in
_OFF_BHH = KCNN + 11        # GRU b_hh (r, z, n)
_NPARAMS = KCNN + 14


# ---- Pallas kernel -----------------------------------------------------------
def ggru_kernel(occ_ref, prc_ref, adjT_ref, hid0_ref, params_ref, y_ref):
    occ = occ_ref[...]                 # (B, S, N) f32
    prc = prc_ref[...]                 # (B, N)
    adjT = adjT_ref[...]               # (N, N): already lw * adj.T (no in-kernel transpose)
    hid = hid0_ref[...]                # (B, N)  GRU hidden state (hidden_size=1 per node)

    # scalar parameters from a single coalesced SMEM vector
    w1sum = params_ref[_OFF_W1SUM]
    cb = params_ref[_OFF_CB]
    wir, wiz, win_ = params_ref[_OFF_WIH + 0], params_ref[_OFF_WIH + 1], params_ref[_OFF_WIH + 2]
    whr, whz, whn = params_ref[_OFF_WHH + 0], params_ref[_OFF_WHH + 1], params_ref[_OFF_WHH + 2]
    bir, biz, binn = params_ref[_OFF_BIH + 0], params_ref[_OFF_BIH + 1], params_ref[_OFF_BIH + 2]
    bhr, bhz, bhn = params_ref[_OFF_BHH + 0], params_ref[_OFF_BHH + 1], params_ref[_OFF_BHH + 2]

    # --- Conv2d(1,1,(KCNN,2)) on stacked [occ, prc], vectorized over (B, SEQ, N) ---
    #   x[b, t, n] = sum_k w[k,0]*occ[b, t+k, n] + prc[b, n]*sum_k w[k,1] + bias
    prc_term = prc * w1sum + cb                                  # (B, N), constant over time
    x = jnp.broadcast_to(prc_term[:, None, :], (B, SEQ, N))
    for k in range(KCNN):
        x = x + params_ref[_OFF_WOCC + k] * occ[:, k:k + SEQ, :]  # (B, SEQ, N)

    # --- GCN for all timesteps: ONE batched MXU matmul instead of SEQ serial ones ---
    # adjT already carries the Linear(1,1) weight; its bias is folded into bir/biz/binn.
    g = jnp.dot(x.reshape(B * SEQ, N), adjT,
                preferred_element_type=jnp.float32).reshape(B, SEQ, N)

    # --- gate input pre-activations for all timesteps (vectorized sweep) ---
    gi_r = g * wir + bir
    gi_z = g * wiz + biz
    gi_n = g * win_ + binn

    # --- serial GRUCell recurrence: pure element-wise VPU/EUP ops over (B, N) ---
    for t in range(SEQ):                                         # statically unrolled
        r = jax.nn.sigmoid(gi_r[:, t, :] + hid * whr + bhr)
        z = jax.nn.sigmoid(gi_z[:, t, :] + hid * whz + bhz)
        nlin = jnp.tanh(gi_n[:, t, :] + r * (hid * whn + bhn))
        hid = nlin + z * (hid - nlin)                            # == (1-z)*n + z*h

    y_ref[...] = hid                   # (B, N)


@jax.jit
def ggru_forward(occ, prc_l, adj, hid0,
                 convw, convb, lw, lb, wih, whh, bih, bhh):
    # ---- constant folding at wrapper time (traced once, off the kernel hot path) ----
    adjT_scaled = (lw[0] * adj).T.astype(jnp.float32)       # X @ (lw*adj).T == lw*(adj @ X^T)^T
    w_occ = convw[0::2]                                     # (KCNN,) occ-channel taps
    w1sum = jnp.sum(convw[1::2])[None]                      # prc-channel taps collapse
    bi_folded = bih + lb[0] * wih                           # fold GCN Linear bias into b_ih
    params = jnp.concatenate(
        [w_occ, w1sum, convb, wih, whh, bi_folded, bhh]).astype(jnp.float32)
    assert params.shape == (_NPARAMS,)

    vmem = pl.BlockSpec(memory_space=pltpu.MemorySpace.VMEM)
    smem = pl.BlockSpec(memory_space=pltpu.MemorySpace.SMEM)
    return pl.pallas_call(
        ggru_kernel,
        out_shape=jax.ShapeDtypeStruct((B, N), jnp.float32),
        in_specs=[vmem, vmem, vmem, vmem, smem],
        out_specs=vmem,
    )(occ, prc_l, adjT_scaled, hid0, params)


# ---- pure-JAX reference (mirrors the PyTorch forward literally) -------------
def ggru_ref(occ, prc_l, adj, hid0, convw, convb, lw, lb, wih, whh, bih, bhh):
    occ_p = jnp.transpose(occ, (0, 2, 1))                       # (B, N, S)
    prc = jnp.repeat(prc_l[:, :, None], S, axis=2)              # (B, N, S)
    fea = jnp.stack([occ_p, prc], axis=3).reshape(B * N, S, 2)  # (BN, S, 2)
    w = convw.reshape(KCNN, 2)
    cols = []
    for t in range(SEQ):
        window = fea[:, t:t + KCNN, :]                          # (BN, KCNN, 2)
        cols.append(jnp.sum(window * w[None], axis=(1, 2)) + convb[0])
    x = jnp.stack(cols, axis=1).reshape(B, N, SEQ)
    hid = hid0.reshape(B * N, 1)
    W_ih = wih.reshape(3, 1)
    W_hh = whh.reshape(3, 1)
    for i in range(SEQ):
        x_in = x[:, :, i][:, :, None]                           # (B, N, 1)
        g = jnp.matmul(adj, x_in) * lw[0] + lb[0]               # (B, N, 1)
        xi = g.reshape(B * N, 1)
        gi = xi @ W_ih.T + bih
        gh = hid @ W_hh.T + bhh
        r = jax.nn.sigmoid(gi[:, 0:1] + gh[:, 0:1])
        z = jax.nn.sigmoid(gi[:, 1:2] + gh[:, 1:2])
        nn_ = jnp.tanh(gi[:, 2:3] + r * gh[:, 2:3])
        hid = (1.0 - z) * nn_ + z * hid
    return hid.reshape(B, N)


if __name__ == "__main__":
    key = jax.random.PRNGKey(0)
    ks = jax.random.split(key, 12)

    # inputs
    occ = jax.random.uniform(ks[0], (B, S, N), jnp.float32)
    prc_l = jax.random.uniform(ks[1], (B, N), jnp.float32)

    # deterministic "parameters" (synthetic, not a checkpoint)
    adj = jax.random.uniform(ks[2], (N, N), jnp.float32) / N     # adjacency (CSV replaced)
    hid0 = jax.random.normal(ks[3], (B, N), jnp.float32)         # torch.randn(b*n,1), deterministic
    convw = 0.2 * jax.random.normal(ks[4], (KCNN * 2,), jnp.float32)   # Conv2d weight (1,1,KCNN,2) flat
    convb = 0.1 * jax.random.normal(ks[5], (1,), jnp.float32)          # Conv2d bias
    lw = 1.0 + 0.1 * jax.random.normal(ks[6], (1,), jnp.float32)       # GCN Linear(1,1) weight
    lb = 0.1 * jax.random.normal(ks[7], (1,), jnp.float32)             # GCN Linear(1,1) bias
    wih = 0.5 * jax.random.normal(ks[8], (3,), jnp.float32)            # GRUCell weight_ih (3,1) flat
    whh = 0.5 * jax.random.normal(ks[9], (3,), jnp.float32)            # GRUCell weight_hh (3,1) flat
    bih = 0.1 * jax.random.normal(ks[10], (3,), jnp.float32)           # GRUCell bias_ih
    bhh = 0.1 * jax.random.normal(ks[11], (3,), jnp.float32)           # GRUCell bias_hh

    y = ggru_forward(occ, prc_l, adj, hid0, convw, convb, lw, lb, wih, whh, bih, bhh)
    y = jax.block_until_ready(y)

    y_ref = ggru_ref(occ, prc_l, adj, hid0, convw, convb, lw, lb, wih, whh, bih, bhh)
    assert y.shape == (B, N)
    assert jnp.allclose(y, y_ref, atol=1e-4, rtol=1e-4), "mismatch vs pure-JAX reference"

    print("KERNEL_OK")
</pallas_src>

<mosaic_0001>
module attributes {stable_mosaic.version = 11 : i64} {
  func.func @ggru_kernel(%arg0: memref<2x12x16xf32, #tpu.memory_space<vmem>>, %arg1: memref<2x16xf32, #tpu.memory_space<vmem>>, %arg2: memref<16x16xf32, #tpu.memory_space<vmem>>, %arg3: memref<2x16xf32, #tpu.memory_space<vmem>>, %arg4: memref<16xf32, #tpu.memory_space<smem>>, %arg5: memref<2x16xf32, #tpu.memory_space<vmem>>) attributes {dimension_semantics = [], scalar_prefetch = 0 : i64, scratch_operands = 0 : i64, tpu.core_type = #tpu.core_type<tc>} {
    %c0 = arith.constant 0 : index
    %c0_0 = arith.constant 0 : index
    %c0_1 = arith.constant 0 : index
    %0 = vector.load %arg0[%c0, %c0_0, %c0_1] : memref<2x12x16xf32, #tpu.memory_space<vmem>>, vector<2x12x16xf32>
    %c0_2 = arith.constant 0 : index
    %c0_3 = arith.constant 0 : index
    %1 = vector.load %arg1[%c0_2, %c0_3] : memref<2x16xf32, #tpu.memory_space<vmem>>, vector<2x16xf32>
    %c0_4 = arith.constant 0 : index
    %c0_5 = arith.constant 0 : index
    %2 = vector.load %arg2[%c0_4, %c0_5] : memref<16x16xf32, #tpu.memory_space<vmem>>, vector<16x16xf32>
    %c0_6 = arith.constant 0 : index
    %c0_7 = arith.constant 0 : index
    %3 = vector.load %arg3[%c0_6, %c0_7] : memref<2x16xf32, #tpu.memory_space<vmem>>, vector<2x16xf32>
    %c2 = arith.constant 2 : index
    %4 = memref.load %arg4[%c2] : memref<16xf32, #tpu.memory_space<smem>>
    %c3 = arith.constant 3 : index
    %5 = memref.load %arg4[%c3] : memref<16xf32, #tpu.memory_space<smem>>
    %c4 = arith.constant 4 : index
    %6 = memref.load %arg4[%c4] : memref<16xf32, #tpu.memory_space<smem>>
    %c5 = arith.constant 5 : index
    %7 = memref.load %arg4[%c5] : memref<16xf32, #tpu.memory_space<smem>>
    %c6 = arith.constant 6 : index
    %8 = memref.load %arg4[%c6] : memref<16xf32, #tpu.memory_space<smem>>
    %c7 = arith.constant 7 : index
    %9 = memref.load %arg4[%c7] : memref<16xf32, #tpu.memory_space<smem>>
    %c8 = arith.constant 8 : index
    %10 = memref.load %arg4[%c8] : memref<16xf32, #tpu.memory_space<smem>>
    %c9 = arith.constant 9 : index
    %11 = memref.load %arg4[%c9] : memref<16xf32, #tpu.memory_space<smem>>
    %c10 = arith.constant 10 : index
    %12 = memref.load %arg4[%c10] : memref<16xf32, #tpu.memory_space<smem>>
    %c11 = arith.constant 11 : index
    %13 = memref.load %arg4[%c11] : memref<16xf32, #tpu.memory_space<smem>>
    %c12 = arith.constant 12 : index
    %14 = memref.load %arg4[%c12] : memref<16xf32, #tpu.memory_space<smem>>
    %c13 = arith.constant 13 : index
    %15 = memref.load %arg4[%c13] : memref<16xf32, #tpu.memory_space<smem>>
    %c14 = arith.constant 14 : index
    %16 = memref.load %arg4[%c14] : memref<16xf32, #tpu.memory_space<smem>>
    %c15 = arith.constant 15 : index
    %17 = memref.load %arg4[%c15] : memref<16xf32, #tpu.memory_space<smem>>
    %18 = vector.broadcast %4 : f32 to vector<2x16xf32>
    %19 = arith.mulf %1, %18 : vector<2x16xf32>
    %20 = vector.broadcast %5 : f32 to vector<2x16xf32>
    %21 = arith.addf %19, %20 : vector<2x16xf32>
    %22 = vector.shape_cast %21 : vector<2x16xf32> to vector<2x1x16xf32>
    %23 = vector.shape_cast %22 : vector<2x1x16xf32> to vector<2x1x16xf32>
    %24 = vector.broadcast %23 : vector<2x1x16xf32> to vector<2x11x16xf32>
    %c0_8 = arith.constant 0 : index
    %25 = memref.load %arg4[%c0_8] : memref<16xf32, #tpu.memory_space<smem>>
    %26 = vector.extract_strided_slice %0 {offsets = [0, 0, 0], sizes = [2, 11, 16], strides = [1, 1, 1]} : vector<2x12x16xf32> to vector<2x11x16xf32>
    %27 = vector.broadcast %25 : f32 to vector<2x11x16xf32>
    %28 = arith.mulf %27, %26 : vector<2x11x16xf32>
    %29 = arith.addf %24, %28 : vector<2x11x16xf32>
    %c1 = arith.constant 1 : index
    %30 = memref.load %arg4[%c1] : memref<16xf32, #tpu.memory_space<smem>>
    %31 = vector.extract_strided_slice %0 {offsets = [0, 1, 0], sizes = [2, 11, 16], strides = [1, 1, 1]} : vector<2x12x16xf32> to vector<2x11x16xf32>
    %32 = vector.broadcast %30 : f32 to vector<2x11x16xf32>
    %33 = arith.mulf %32, %31 : vector<2x11x16xf32>
    %34 = arith.addf %29, %33 : vector<2x11x16xf32>
    %35 = vector.shape_cast %34 : vector<2x11x16xf32> to vector<22x16xf32>
    %cst = arith.constant dense<0.000000e+00> : vector<22x16xf32>
    %36 = tpu.matmul %35, %2, %cst {dimension_numbers = #tpu.dot_dimension_numbers<[1], [0], [0], [1], [0, 0, 1, 1], [], []>} : vector<22x16xf32>, vector<16x16xf32>, vector<22x16xf32> -> vector<22x16xf32>
    %37 = vector.shape_cast %36 : vector<22x16xf32> to vector<2x11x16xf32>
    %38 = vector.broadcast %6 : f32 to vector<2x11x16xf32>
    %39 = arith.mulf %37, %38 : vector<2x11x16xf32>
    %40 = vector.broadcast %12 : f32 to vector<2x11x16xf32>
    %41 = arith.addf %39, %40 : vector<2x11x16xf32>
    %42 = vector.broadcast %7 : f32 to vector<2x11x16xf32>
    %43 = arith.mulf %37, %42 : vector<2x11x16xf32>
    %44 = vector.broadcast %13 : f32 to vector<2x11x16xf32>
    %45 = arith.addf %43, %44 : vector<2x11x16xf32>
    %46 = vector.broadcast %8 : f32 to vector<2x11x16xf32>
    %47 = arith.mulf %37, %46 : vector<2x11x16xf32>
    %48 = vector.broadcast %14 : f32 to vector<2x11x16xf32>
    %49 = arith.addf %47, %48 : vector<2x11x16xf32>
    %50 = vector.extract_strided_slice %41 {offsets = [0, 0, 0], sizes = [2, 1, 16], strides = [1, 1, 1]} : vector<2x11x16xf32> to vector<2x1x16xf32>
    %51 = vector.shape_cast %50 : vector<2x1x16xf32> to vector<2x16xf32>
    %52 = vector.broadcast %9 : f32 to vector<2x16xf32>
    %53 = arith.mulf %3, %52 : vector<2x16xf32>
    %54 = arith.addf %51, %53 : vector<2x16xf32>
    %55 = vector.broadcast %15 : f32 to vector<2x16xf32>
    %56 = arith.addf %54, %55 : vector<2x16xf32>
    %57 = arith.negf %56 : vector<2x16xf32>
    %58 = math.exp %57 : vector<2x16xf32>
    %cst_9 = arith.constant 1.000000e+00 : f32
    %59 = vector.broadcast %cst_9 : f32 to vector<2x16xf32>
    %60 = arith.addf %59, %58 : vector<2x16xf32>
    %61 = arith.divf %59, %60 : vector<2x16xf32>
    %62 = vector.extract_strided_slice %45 {offsets = [0, 0, 0], sizes = [2, 1, 16], strides = [1, 1, 1]} : vector<2x11x16xf32> to vector<2x1x16xf32>
    %63 = vector.shape_cast %62 : vector<2x1x16xf32> to vector<2x16xf32>
    %64 = vector.broadcast %10 : f32 to vector<2x16xf32>
    %65 = arith.mulf %3, %64 : vector<2x16xf32>
    %66 = arith.addf %63, %65 : vector<2x16xf32>
    %67 = vector.broadcast %16 : f32 to vector<2x16xf32>
    %68 = arith.addf %66, %67 : vector<2x16xf32>
    %69 = arith.negf %68 : vector<2x16xf32>
    %70 = math.exp %69 : vector<2x16xf32>
    %cst_10 = arith.constant 1.000000e+00 : f32
    %71 = vector.broadcast %cst_10 : f32 to vector<2x16xf32>
    %72 = arith.addf %71, %70 : vector<2x16xf32>
    %73 = arith.divf %71, %72 : vector<2x16xf32>
    %74 = vector.extract_strided_slice %49 {offsets = [0, 0, 0], sizes = [2, 1, 16], strides = [1, 1, 1]} : vector<2x11x16xf32> to vector<2x1x16xf32>
    %75 = vector.shape_cast %74 : vector<2x1x16xf32> to vector<2x16xf32>
    %76 = vector.broadcast %11 : f32 to vector<2x16xf32>
    %77 = arith.mulf %3, %76 : vector<2x16xf32>
    %78 = vector.broadcast %17 : f32 to vector<2x16xf32>
    %79 = arith.addf %77, %78 : vector<2x16xf32>
    %80 = arith.mulf %61, %79 : vector<2x16xf32>
    %81 = arith.addf %75, %80 : vector<2x16xf32>
    %82 = math.tanh %81 : vector<2x16xf32>
    %83 = arith.subf %3, %82 : vector<2x16xf32>
    %84 = arith.mulf %73, %83 : vector<2x16xf32>
    %85 = arith.addf %82, %84 : vector<2x16xf32>
    %86 = vector.extract_strided_slice %41 {offsets = [0, 1, 0], sizes = [2, 1, 16], strides = [1, 1, 1]} : vector<2x11x16xf32> to vector<2x1x16xf32>
    %87 = vector.shape_cast %86 : vector<2x1x16xf32> to vector<2x16xf32>
    %88 = vector.broadcast %9 : f32 to vector<2x16xf32>
    %89 = arith.mulf %85, %88 : vector<2x16xf32>
    %90 = arith.addf %87, %89 : vector<2x16xf32>
    %91 = vector.broadcast %15 : f32 to vector<2x16xf32>
    %92 = arith.addf %90, %91 : vector<2x16xf32>
    %93 = arith.negf %92 : vector<2x16xf32>
    %94 = math.exp %93 : vector<2x16xf32>
    %cst_11 = arith.constant 1.000000e+00 : f32
    %95 = vector.broadcast %cst_11 : f32 to vector<2x16xf32>
    %96 = arith.addf %95, %94 : vector<2x16xf32>
    %97 = arith.divf %95, %96 : vector<2x16xf32>
    %98 = vector.extract_strided_slice %45 {offsets = [0, 1, 0], sizes = [2, 1, 16], strides = [1, 1, 1]} : vector<2x11x16xf32> to vector<2x1x16xf32>
    %99 = vector.shape_cast %98 : vector<2x1x16xf32> to vector<2x16xf32>
    %100 = vector.broadcast %10 : f32 to vector<2x16xf32>
    %101 = arith.mulf %85, %100 : vector<2x16xf32>
    %102 = arith.addf %99, %101 : vector<2x16xf32>
    %103 = vector.broadcast %16 : f32 to vector<2x16xf32>
    %104 = arith.addf %102, %103 : vector<2x16xf32>
    %105 = arith.negf %104 : vector<2x16xf32>
    %106 = math.exp %105 : vector<2x16xf32>
    %cst_12 = arith.constant 1.000000e+00 : f32
    %107 = vector.broadcast %cst_12 : f32 to vector<2x16xf32>
    %108 = arith.addf %107, %106 : vector<2x16xf32>
    %109 = arith.divf %107, %108 : vector<2x16xf32>
    %110 = vector.extract_strided_slice %49 {offsets = [0, 1, 0], sizes = [2, 1, 16], strides = [1, 1, 1]} : vector<2x11x16xf32> to vector<2x1x16xf32>
    %111 = vector.shape_cast %110 : vector<2x1x16xf32> to vector<2x16xf32>
    %112 = vector.broadcast %11 : f32 to vector<2x16xf32>
    %113 = arith.mulf %85, %112 : vector<2x16xf32>
    %114 = vector.broadcast %17 : f32 to vector<2x16xf32>
    %115 = arith.addf %113, %114 : vector<2x16xf32>
    %116 = arith.mulf %97, %115 : vector<2x16xf32>
    %117 = arith.addf %111, %116 : vector<2x16xf32>
    %118 = math.tanh %117 : vector<2x16xf32>
    %119 = arith.subf %85, %118 : vector<2x16xf32>
    %120 = arith.mulf %109, %119 : vector<2x16xf32>
    %121 = arith.addf %118, %120 : vector<2x16xf32>
    %122 = vector.extract_strided_slice %41 {offsets = [0, 2, 0], sizes = [2, 1, 16], strides = [1, 1, 1]} : vector<2x11x16xf32> to vector<2x1x16xf32>
    %123 = vector.shape_cast %122 : vector<2x1x16xf32> to vector<2x16xf32>
    %124 = vector.broadcast %9 : f32 to vector<2x16xf32>
    %125 = arith.mulf %121, %124 : vector<2x16xf32>
    %126 = arith.addf %123, %125 : vector<2x16xf32>
    %127 = vector.broadcast %15 : f32 to vector<2x16xf32>
    %128 = arith.addf %126, %127 : vector<2x16xf32>
    %129 = arith.negf %128 : vector<2x16xf32>
    %130 = math.exp %129 : vector<2x16xf32>
    %cst_13 = arith.constant 1.000000e+00 : f32
    %131 = vector.broadcast %cst_13 : f32 to vector<2x16xf32>
    %132 = arith.addf %131, %130 : vector<2x16xf32>
    %133 = arith.divf %131, %132 : vector<2x16xf32>
    %134 = vector.extract_strided_slice %45 {offsets = [0, 2, 0], sizes = [2, 1, 16], strides = [1, 1, 1]} : vector<2x11x16xf32> to vector<2x1x16xf32>
    %135 = vector.shape_cast %134 : vector<2x1x16xf32> to vector<2x16xf32>
    %136 = vector.broadcast %10 : f32 to vector<2x16xf32>
    %137 = arith.mulf %121, %136 : vector<2x16xf32>
    %138 = arith.addf %135, %137 : vector<2x16xf32>
    %139 = vector.broadcast %16 : f32 to vector<2x16xf32>
    %140 = arith.addf %138, %139 : vector<2x16xf32>
    %141 = arith.negf %140 : vector<2x16xf32>
    %142 = math.exp %141 : vector<2x16xf32>
    %cst_14 = arith.constant 1.000000e+00 : f32
    %143 = vector.broadcast %cst_14 : f32 to vector<2x16xf32>
    %144 = arith.addf %143, %142 : vector<2x16xf32>
    %145 = arith.divf %143, %144 : vector<2x16xf32>
    %146 = vector.extract_strided_slice %49 {offsets = [0, 2, 0], sizes = [2, 1, 16], strides = [1, 1, 1]} : vector<2x11x16xf32> to vector<2x1x16xf32>
    %147 = vector.shape_cast %146 : vector<2x1x16xf32> to vector<2x16xf32>
    %148 = vector.broadcast %11 : f32 to vector<2x16xf32>
    %149 = arith.mulf %121, %148 : vector<2x16xf32>
    %150 = vector.broadcast %17 : f32 to vector<2x16xf32>
    %151 = arith.addf %149, %150 : vector<2x16xf32>
    %152 = arith.mulf %133, %151 : vector<2x16xf32>
    %153 = arith.addf %147, %152 : vector<2x16xf32>
    %154 = math.tanh %153 : vector<2x16xf32>
    %155 = arith.subf %121, %154 : vector<2x16xf32>
    %156 = arith.mulf %145, %155 : vector<2x16xf32>
    %157 = arith.addf %154, %156 : vector<2x16xf32>
    %158 = vector.extract_strided_slice %41 {offsets = [0, 3, 0], sizes = [2, 1, 16], strides = [1, 1, 1]} : vector<2x11x16xf32> to vector<2x1x16xf32>
    %159 = vector.shape_cast %158 : vector<2x1x16xf32> to vector<2x16xf32>
    %160 = vector.broadcast %9 : f32 to vector<2x16xf32>
    %161 = arith.mulf %157, %160 : vector<2x16xf32>
    %162 = arith.addf %159, %161 : vector<2x16xf32>
    %163 = vector.broadcast %15 : f32 to vector<2x16xf32>
    %164 = arith.addf %162, %163 : vector<2x16xf32>
    %165 = arith.negf %164 : vector<2x16xf32>
    %166 = math.exp %165 : vector<2x16xf32>
    %cst_15 = arith.constant 1.000000e+00 : f32
    %167 = vector.broadcast %cst_15 : f32 to vector<2x16xf32>
    %168 = arith.addf %167, %166 : vector<2x16xf32>
    %169 = arith.divf %167, %168 : vector<2x16xf32>
    %170 = vector.extract_strided_slice %45 {offsets = [0, 3, 0], sizes = [2, 1, 16], strides = [1, 1, 1]} : vector<2x11x16xf32> to vector<2x1x16xf32>
    %171 = vector.shape_cast %170 : vector<2x1x16xf32> to vector<2x16xf32>
    %172 = vector.broadcast %10 : f32 to vector<2x16xf32>
    %173 = arith.mulf %157, %172 : vector<2x16xf32>
    %174 = arith.addf %171, %173 : vector<2x16xf32>
    %175 = vector.broadcast %16 : f32 to vector<2x16xf32>
    %176 = arith.addf %174, %175 : vector<2x16xf32>
    %177 = arith.negf %176 : vector<2x16xf32>
    %178 = math.exp %177 : vector<2x16xf32>
    %cst_16 = arith.constant 1.000000e+00 : f32
    %179 = vector.broadcast %cst_16 : f32 to vector<2x16xf32>
    %180 = arith.addf %179, %178 : vector<2x16xf32>
    %181 = arith.divf %179, %180 : vector<2x16xf32>
    %182 = vector.extract_strided_slice %49 {offsets = [0, 3, 0], sizes = [2, 1, 16], strides = [1, 1, 1]} : vector<2x11x16xf32> to vector<2x1x16xf32>
    %183 = vector.shape_cast %182 : vector<2x1x16xf32> to vector<2x16xf32>
    %184 = vector.broadcast %11 : f32 to vector<2x16xf32>
    %185 = arith.mulf %157, %184 : vector<2x16xf32>
    %186 = vector.broadcast %17 : f32 to vector<2x16xf32>
    %187 = arith.addf %185, %186 : vector<2x16xf32>
    %188 = arith.mulf %169, %187 : vector<2x16xf32>
    %189 = arith.addf %183, %188 : vector<2x16xf32>
    %190 = math.tanh %189 : vector<2x16xf32>
    %191 = arith.subf %157, %190 : vector<2x16xf32>
    %192 = arith.mulf %181, %191 : vector<2x16xf32>
    %193 = arith.addf %190, %192 : vector<2x16xf32>
    %194 = vector.extract_strided_slice %41 {offsets = [0, 4, 0], sizes = [2, 1, 16], strides = [1, 1, 1]} : vector<2x11x16xf32> to vector<2x1x16xf32>
    %195 = vector.shape_cast %194 : vector<2x1x16xf32> to vector<2x16xf32>
    %196 = vector.broadcast %9 : f32 to vector<2x16xf32>
    %197 = arith.mulf %193, %196 : vector<2x16xf32>
    %198 = arith.addf %195, %197 : vector<2x16xf32>
    %199 = vector.broadcast %15 : f32 to vector<2x16xf32>
    %200 = arith.addf %198, %199 : vector<2x16xf32>
    %201 = arith.negf %200 : vector<2x16xf32>
    %202 = math.exp %201 : vector<2x16xf32>
    %cst_17 = arith.constant 1.000000e+00 : f32
    %203 = vector.broadcast %cst_17 : f32 to vector<2x16xf32>
    %204 = arith.addf %203, %202 : vector<2x16xf32>
    %205 = arith.divf %203, %204 : vector<2x16xf32>
    %206 = vector.extract_strided_slice %45 {offsets = [0, 4, 0], sizes = [2, 1, 16], strides = [1, 1, 1]} : vector<2x11x16xf32> to vector<2x1x16xf32>
    %207 = vector.shape_cast %206 : vector<2x1x16xf32> to vector<2x16xf32>
    %208 = vector.broadcast %10 : f32 to vector<2x16xf32>
    %209 = arith.mulf %193, %208 : vector<2x16xf32>
    %210 = arith.addf %207, %209 : vector<2x16xf32>
    %211 = vector.broadcast %16 : f32 to vector<2x16xf32>
    %212 = arith.addf %210, %211 : vector<2x16xf32>
    %213 = arith.negf %212 : vector<2x16xf32>
    %214 = math.exp %213 : vector<2x16xf32>
    %cst_18 = arith.constant 1.000000e+00 : f32
    %215 = vector.broadcast %cst_18 : f32 to vector<2x16xf32>
    %216 = arith.addf %215, %214 : vector<2x16xf32>
    %217 = arith.divf %215, %216 : vector<2x16xf32>
    %218 = vector.extract_strided_slice %49 {offsets = [0, 4, 0], sizes = [2, 1, 16], strides = [1, 1, 1]} : vector<2x11x16xf32> to vector<2x1x16xf32>
    %219 = vector.shape_cast %218 : vector<2x1x16xf32> to vector<2x16xf32>
    %220 = vector.broadcast %11 : f32 to vector<2x16xf32>
    %221 = arith.mulf %193, %220 : vector<2x16xf32>
    %222 = vector.broadcast %17 : f32 to vector<2x16xf32>
    %223 = arith.addf %221, %222 : vector<2x16xf32>
    %224 = arith.mulf %205, %223 : vector<2x16xf32>
    %225 = arith.addf %219, %224 : vector<2x16xf32>
    %226 = math.tanh %225 : vector<2x16xf32>
    %227 = arith.subf %193, %226 : vector<2x16xf32>
    %228 = arith.mulf %217, %227 : vector<2x16xf32>
    %229 = arith.addf %226, %228 : vector<2x16xf32>
    %230 = vector.extract_strided_slice %41 {offsets = [0, 5, 0], sizes = [2, 1, 16], strides = [1, 1, 1]} : vector<2x11x16xf32> to vector<2x1x16xf32>
    %231 = vector.shape_cast %230 : vector<2x1x16xf32> to vector<2x16xf32>
    %232 = vector.broadcast %9 : f32 to vector<2x16xf32>
    %233 = arith.mulf %229, %232 : vector<2x16xf32>
    %234 = arith.addf %231, %233 : vector<2x16xf32>
    %235 = vector.broadcast %15 : f32 to vector<2x16xf32>
    %236 = arith.addf %234, %235 : vector<2x16xf32>
    %237 = arith.negf %236 : vector<2x16xf32>
    %238 = math.exp %237 : vector<2x16xf32>
    %cst_19 = arith.constant 1.000000e+00 : f32
    %239 = vector.broadcast %cst_19 : f32 to vector<2x16xf32>
    %240 = arith.addf %239, %238 : vector<2x16xf32>
    %241 = arith.divf %239, %240 : vector<2x16xf32>
    %242 = vector.extract_strided_slice %45 {offsets = [0, 5, 0], sizes = [2, 1, 16], strides = [1, 1, 1]} : vector<2x11x16xf32> to vector<2x1x16xf32>
    %243 = vector.shape_cast %242 : vector<2x1x16xf32> to vector<2x16xf32>
    %244 = vector.broadcast %10 : f32 to vector<2x16xf32>
    %245 = arith.mulf %229, %244 : vector<2x16xf32>
    %246 = arith.addf %243, %245 : vector<2x16xf32>
    %247 = vector.broadcast %16 : f32 to vector<2x16xf32>
    %248 = arith.addf %246, %247 : vector<2x16xf32>
    %249 = arith.negf %248 : vector<2x16xf32>
    %250 = math.exp %249 : vector<2x16xf32>
    %cst_20 = arith.constant 1.000000e+00 : f32
    %251 = vector.broadcast %cst_20 : f32 to vector<2x16xf32>
    %252 = arith.addf %251, %250 : vector<2x16xf32>
    %253 = arith.divf %251, %252 : vector<2x16xf32>
    %254 = vector.extract_strided_slice %49 {offsets = [0, 5, 0], sizes = [2, 1, 16], strides = [1, 1, 1]} : vector<2x11x16xf32> to vector<2x1x16xf32>
    %255 = vector.shape_cast %254 : vector<2x1x16xf32> to vector<2x16xf32>
    %256 = vector.broadcast %11 : f32 to vector<2x16xf32>
    %257 = arith.mulf %229, %256 : vector<2x16xf32>
    %258 = vector.broadcast %17 : f32 to vector<2x16xf32>
    %259 = arith.addf %257, %258 : vector<2x16xf32>
    %260 = arith.mulf %241, %259 : vector<2x16xf32>
    %261 = arith.addf %255, %260 : vector<2x16xf32>
    %262 = math.tanh %261 : vector<2x16xf32>
    %263 = arith.subf %229, %262 : vector<2x16xf32>
    %264 = arith.mulf %253, %263 : vector<2x16xf32>
    %265 = arith.addf %262, %264 : vector<2x16xf32>
    %266 = vector.extract_strided_slice %41 {offsets = [0, 6, 0], sizes = [2, 1, 16], strides = [1, 1, 1]} : vector<2x11x16xf32> to vector<2x1x16xf32>
    %267 = vector.shape_cast %266 : vector<2x1x16xf32> to vector<2x16xf32>
    %268 = vector.broadcast %9 : f32 to vector<2x16xf32>
    %269 = arith.mulf %265, %268 : vector<2x16xf32>
    %270 = arith.addf %267, %269 : vector<2x16xf32>
    %271 = vector.broadcast %15 : f32 to vector<2x16xf32>
    %272 = arith.addf %270, %271 : vector<2x16xf32>
    %273 = arith.negf %272 : vector<2x16xf32>
    %274 = math.exp %273 : vector<2x16xf32>
    %cst_21 = arith.constant 1.000000e+00 : f32
    %275 = vector.broadcast %cst_21 : f32 to vector<2x16xf32>
    %276 = arith.addf %275, %274 : vector<2x16xf32>
    %277 = arith.divf %275, %276 : vector<2x16xf32>
    %278 = vector.extract_strided_slice %45 {offsets = [0, 6, 0], sizes = [2, 1, 16], strides = [1, 1, 1]} : vector<2x11x16xf32> to vector<2x1x16xf32>
    %279 = vector.shape_cast %278 : vector<2x1x16xf32> to vector<2x16xf32>
    %280 = vector.broadcast %10 : f32 to vector<2x16xf32>
    %281 = arith.mulf %265, %280 : vector<2x16xf32>
    %282 = arith.addf %279, %281 : vector<2x16xf32>
    %283 = vector.broadcast %16 : f32 to vector<2x16xf32>
    %284 = arith.addf %282, %283 : vector<2x16xf32>
    %285 = arith.negf %284 : vector<2x16xf32>
    %286 = math.exp %285 : vector<2x16xf32>
    %cst_22 = arith.constant 1.000000e+00 : f32
    %287 = vector.broadcast %cst_22 : f32 to vector<2x16xf32>
    %288 = arith.addf %287, %286 : vector<2x16xf32>
    %289 = arith.divf %287, %288 : vector<2x16xf32>
    %290 = vector.extract_strided_slice %49 {offsets = [0, 6, 0], sizes = [2, 1, 16], strides = [1, 1, 1]} : vector<2x11x16xf32> to vector<2x1x16xf32>
    %291 = vector.shape_cast %290 : vector<2x1x16xf32> to vector<2x16xf32>
    %292 = vector.broadcast %11 : f32 to vector<2x16xf32>
    %293 = arith.mulf %265, %292 : vector<2x16xf32>
    %294 = vector.broadcast %17 : f32 to vector<2x16xf32>
    %295 = arith.addf %293, %294 : vector<2x16xf32>
    %296 = arith.mulf %277, %295 : vector<2x16xf32>
    %297 = arith.addf %291, %296 : vector<2x16xf32>
    %298 = math.tanh %297 : vector<2x16xf32>
    %299 = arith.subf %265, %298 : vector<2x16xf32>
    %300 = arith.mulf %289, %299 : vector<2x16xf32>
    %301 = arith.addf %298, %300 : vector<2x16xf32>
    %302 = vector.extract_strided_slice %41 {offsets = [0, 7, 0], sizes = [2, 1, 16], strides = [1, 1, 1]} : vector<2x11x16xf32> to vector<2x1x16xf32>
    %303 = vector.shape_cast %302 : vector<2x1x16xf32> to vector<2x16xf32>
    %304 = vector.broadcast %9 : f32 to vector<2x16xf32>
    %305 = arith.mulf %301, %304 : vector<2x16xf32>
    %306 = arith.addf %303, %305 : vector<2x16xf32>
    %307 = vector.broadcast %15 : f32 to vector<2x16xf32>
    %308 = arith.addf %306, %307 : vector<2x16xf32>
    %309 = arith.negf %308 : vector<2x16xf32>
    %310 = math.exp %309 : vector<2x16xf32>
    %cst_23 = arith.constant 1.000000e+00 : f32
    %311 = vector.broadcast %cst_23 : f32 to vector<2x16xf32>
    %312 = arith.addf %311, %310 : vector<2x16xf32>
    %313 = arith.divf %311, %312 : vector<2x16xf32>
    %314 = vector.extract_strided_slice %45 {offsets = [0, 7, 0], sizes = [2, 1, 16], strides = [1, 1, 1]} : vector<2x11x16xf32> to vector<2x1x16xf32>
    %315 = vector.shape_cast %314 : vector<2x1x16xf32> to vector<2x16xf32>
    %316 = vector.broadcast %10 : f32 to vector<2x16xf32>
    %317 = arith.mulf %301, %316 : vector<2x16xf32>
    %318 = arith.addf %315, %317 : vector<2x16xf32>
    %319 = vector.broadcast %16 : f32 to vector<2x16xf32>
    %320 = arith.addf %318, %319 : vector<2x16xf32>
    %321 = arith.negf %320 : vector<2x16xf32>
    %322 = math.exp %321 : vector<2x16xf32>
    %cst_24 = arith.constant 1.000000e+00 : f32
    %323 = vector.broadcast %cst_24 : f32 to vector<2x16xf32>
    %324 = arith.addf %323, %322 : vector<2x16xf32>
    %325 = arith.divf %323, %324 : vector<2x16xf32>
    %326 = vector.extract_strided_slice %49 {offsets = [0, 7, 0], sizes = [2, 1, 16], strides = [1, 1, 1]} : vector<2x11x16xf32> to vector<2x1x16xf32>
    %327 = vector.shape_cast %326 : vector<2x1x16xf32> to vector<2x16xf32>
    %328 = vector.broadcast %11 : f32 to vector<2x16xf32>
    %329 = arith.mulf %301, %328 : vector<2x16xf32>
    %330 = vector.broadcast %17 : f32 to vector<2x16xf32>
    %331 = arith.addf %329, %330 : vector<2x16xf32>
    %332 = arith.mulf %313, %331 : vector<2x16xf32>
    %333 = arith.addf %327, %332 : vector<2x16xf32>
    %334 = math.tanh %333 : vector<2x16xf32>
    %335 = arith.subf %301, %334 : vector<2x16xf32>
    %336 = arith.mulf %325, %335 : vector<2x16xf32>
    %337 = arith.addf %334, %336 : vector<2x16xf32>
    %338 = vector.extract_strided_slice %41 {offsets = [0, 8, 0], sizes = [2, 1, 16], strides = [1, 1, 1]} : vector<2x11x16xf32> to vector<2x1x16xf32>
    %339 = vector.shape_cast %338 : vector<2x1x16xf32> to vector<2x16xf32>
    %340 = vector.broadcast %9 : f32 to vector<2x16xf32>
    %341 = arith.mulf %337, %340 : vector<2x16xf32>
    %342 = arith.addf %339, %341 : vector<2x16xf32>
    %343 = vector.broadcast %15 : f32 to vector<2x16xf32>
    %344 = arith.addf %342, %343 : vector<2x16xf32>
    %345 = arith.negf %344 : vector<2x16xf32>
    %346 = math.exp %345 : vector<2x16xf32>
    %cst_25 = arith.constant 1.000000e+00 : f32
    %347 = vector.broadcast %cst_25 : f32 to vector<2x16xf32>
    %348 = arith.addf %347, %346 : vector<2x16xf32>
    %349 = arith.divf %347, %348 : vector<2x16xf32>
    %350 = vector.extract_strided_slice %45 {offsets = [0, 8, 0], sizes = [2, 1, 16], strides = [1, 1, 1]} : vector<2x11x16xf32> to vector<2x1x16xf32>
    %351 = vector.shape_cast %350 : vector<2x1x16xf32> to vector<2x16xf32>
    %352 = vector.broadcast %10 : f32 to vector<2x16xf32>
    %353 = arith.mulf %337, %352 : vector<2x16xf32>
    %354 = arith.addf %351, %353 : vector<2x16xf32>
    %355 = vector.broadcast %16 : f32 to vector<2x16xf32>
    %356 = arith.addf %354, %355 : vector<2x16xf32>
    %357 = arith.negf %356 : vector<2x16xf32>
    %358 = math.exp %357 : vector<2x16xf32>
    %cst_26 = arith.constant 1.000000e+00 : f32
    %359 = vector.broadcast %cst_26 : f32 to vector<2x16xf32>
    %360 = arith.addf %359, %358 : vector<2x16xf32>
    %361 = arith.divf %359, %360 : vector<2x16xf32>
    %362 = vector.extract_strided_slice %49 {offsets = [0, 8, 0], sizes = [2, 1, 16], strides = [1, 1, 1]} : vector<2x11x16xf32> to vector<2x1x16xf32>
    %363 = vector.shape_cast %362 : vector<2x1x16xf32> to vector<2x16xf32>
    %364 = vector.broadcast %11 : f32 to vector<2x16xf32>
    %365 = arith.mulf %337, %364 : vector<2x16xf32>
    %366 = vector.broadcast %17 : f32 to vector<2x16xf32>
    %367 = arith.addf %365, %366 : vector<2x16xf32>
    %368 = arith.mulf %349, %367 : vector<2x16xf32>
    %369 = arith.addf %363, %368 : vector<2x16xf32>
    %370 = math.tanh %369 : vector<2x16xf32>
    %371 = arith.subf %337, %370 : vector<2x16xf32>
    %372 = arith.mulf %361, %371 : vector<2x16xf32>
    %373 = arith.addf %370, %372 : vector<2x16xf32>
    %374 = vector.extract_strided_slice %41 {offsets = [0, 9, 0], sizes = [2, 1, 16], strides = [1, 1, 1]} : vector<2x11x16xf32> to vector<2x1x16xf32>
    %375 = vector.shape_cast %374 : vector<2x1x16xf32> to vector<2x16xf32>
    %376 = vector.broadcast %9 : f32 to vector<2x16xf32>
    %377 = arith.mulf %373, %376 : vector<2x16xf32>
    %378 = arith.addf %375, %377 : vector<2x16xf32>
    %379 = vector.broadcast %15 : f32 to vector<2x16xf32>
    %380 = arith.addf %378, %379 : vector<2x16xf32>
    %381 = arith.negf %380 : vector<2x16xf32>
    %382 = math.exp %381 : vector<2x16xf32>
    %cst_27 = arith.constant 1.000000e+00 : f32
    %383 = vector.broadcast %cst_27 : f32 to vector<2x16xf32>
    %384 = arith.addf %383, %382 : vector<2x16xf32>
    %385 = arith.divf %383, %384 : vector<2x16xf32>
    %386 = vector.extract_strided_slice %45 {offsets = [0, 9, 0], sizes = [2, 1, 16], strides = [1, 1, 1]} : vector<2x11x16xf32> to vector<2x1x16xf32>
    %387 = vector.shape_cast %386 : vector<2x1x16xf32> to vector<2x16xf32>
    %388 = vector.broadcast %10 : f32 to vector<2x16xf32>
    %389 = arith.mulf %373, %388 : vector<2x16xf32>
    %390 = arith.addf %387, %389 : vector<2x16xf32>
    %391 = vector.broadcast %16 : f32 to vector<2x16xf32>
    %392 = arith.addf %390, %391 : vector<2x16xf32>
    %393 = arith.negf %392 : vector<2x16xf32>
    %394 = math.exp %393 : vector<2x16xf32>
    %cst_28 = arith.constant 1.000000e+00 : f32
    %395 = vector.broadcast %cst_28 : f32 to vector<2x16xf32>
    %396 = arith.addf %395, %394 : vector<2x16xf32>
    %397 = arith.divf %395, %396 : vector<2x16xf32>
    %398 = vector.extract_strided_slice %49 {offsets = [0, 9, 0], sizes = [2, 1, 16], strides = [1, 1, 1]} : vector<2x11x16xf32> to vector<2x1x16xf32>
    %399 = vector.shape_cast %398 : vector<2x1x16xf32> to vector<2x16xf32>
    %400 = vector.broadcast %11 : f32 to vector<2x16xf32>
    %401 = arith.mulf %373, %400 : vector<2x16xf32>
    %402 = vector.broadcast %17 : f32 to vector<2x16xf32>
    %403 = arith.addf %401, %402 : vector<2x16xf32>
    %404 = arith.mulf %385, %403 : vector<2x16xf32>
    %405 = arith.addf %399, %404 : vector<2x16xf32>
    %406 = math.tanh %405 : vector<2x16xf32>
    %407 = arith.subf %373, %406 : vector<2x16xf32>
    %408 = arith.mulf %397, %407 : vector<2x16xf32>
    %409 = arith.addf %406, %408 : vector<2x16xf32>
    %410 = vector.extract_strided_slice %41 {offsets = [0, 10, 0], sizes = [2, 1, 16], strides = [1, 1, 1]} : vector<2x11x16xf32> to vector<2x1x16xf32>
    %411 = vector.shape_cast %410 : vector<2x1x16xf32> to vector<2x16xf32>
    %412 = vector.broadcast %9 : f32 to vector<2x16xf32>
    %413 = arith.mulf %409, %412 : vector<2x16xf32>
    %414 = arith.addf %411, %413 : vector<2x16xf32>
    %415 = vector.broadcast %15 : f32 to vector<2x16xf32>
    %416 = arith.addf %414, %415 : vector<2x16xf32>
    %417 = arith.negf %416 : vector<2x16xf32>
    %418 = math.exp %417 : vector<2x16xf32>
    %cst_29 = arith.constant 1.000000e+00 : f32
    %419 = vector.broadcast %cst_29 : f32 to vector<2x16xf32>
    %420 = arith.addf %419, %418 : vector<2x16xf32>
    %421 = arith.divf %419, %420 : vector<2x16xf32>
    %422 = vector.extract_strided_slice %45 {offsets = [0, 10, 0], sizes = [2, 1, 16], strides = [1, 1, 1]} : vector<2x11x16xf32> to vector<2x1x16xf32>
    %423 = vector.shape_cast %422 : vector<2x1x16xf32> to vector<2x16xf32>
    %424 = vector.broadcast %10 : f32 to vector<2x16xf32>
    %425 = arith.mulf %409, %424 : vector<2x16xf32>
    %426 = arith.addf %423, %425 : vector<2x16xf32>
    %427 = vector.broadcast %16 : f32 to vector<2x16xf32>
    %428 = arith.addf %426, %427 : vector<2x16xf32>
    %429 = arith.negf %428 : vector<2x16xf32>
    %430 = math.exp %429 : vector<2x16xf32>
    %cst_30 = arith.constant 1.000000e+00 : f32
    %431 = vector.broadcast %cst_30 : f32 to vector<2x16xf32>
    %432 = arith.addf %431, %430 : vector<2x16xf32>
    %433 = arith.divf %431, %432 : vector<2x16xf32>
    %434 = vector.extract_strided_slice %49 {offsets = [0, 10, 0], sizes = [2, 1, 16], strides = [1, 1, 1]} : vector<2x11x16xf32> to vector<2x1x16xf32>
    %435 = vector.shape_cast %434 : vector<2x1x16xf32> to vector<2x16xf32>
    %436 = vector.broadcast %11 : f32 to vector<2x16xf32>
    %437 = arith.mulf %409, %436 : vector<2x16xf32>
    %438 = vector.broadcast %17 : f32 to vector<2x16xf32>
    %439 = arith.addf %437, %438 : vector<2x16xf32>
    %440 = arith.mulf %421, %439 : vector<2x16xf32>
    %441 = arith.addf %435, %440 : vector<2x16xf32>
    %442 = math.tanh %441 : vector<2x16xf32>
    %443 = arith.subf %409, %442 : vector<2x16xf32>
    %444 = arith.mulf %433, %443 : vector<2x16xf32>
    %445 = arith.addf %442, %444 : vector<2x16xf32>
    %c0_31 = arith.constant 0 : index
    %c0_32 = arith.constant 0 : index
    %446 = vector.load %arg5[%c0_31, %c0_32] : memref<2x16xf32, #tpu.memory_space<vmem>>, vector<2x16xf32>
    tpu.vector_store %arg5[%c0_31, %c0_32], %445 {strides = array<i32>} : memref<2x16xf32, #tpu.memory_space<vmem>>, vector<2x16xf32>,
    return
  }
}

</mosaic_0001>

<bundles_post_ra>
// kernel: ggru_forward.1
= control target key start
LH: loop header
LB: loop body
LE: loop exit
PB: predicated region body
PF: predicated region fallthrough
CT: control target
= control target key end

     0   :  { %10 = vsyncpa [#allocation4], 0  ;;  %s2591_s0 = inlined_call_operand.vmem [shape: f32[2,12,16], index: 0, kind: input, shape index: {}]   ;;  %s2592_s1 = inlined_call_operand.vmem [shape: f32[2,16], index: 1, kind: input, shape index: {}]   ;;  %s2593_s2 = inlined_call_operand.vmem [shape: f32[16,16], index: 2, kind: input, shape index: {}]   ;;  %s2594_s3 = inlined_call_operand.vmem [shape: f32[2,16], index: 3, kind: input, shape index: {}]   ;;  %s2595_s4 = inlined_call_operand.vmem [shape: f32[16], index: 4, kind: input, shape index: {}]   ;;  %s2596_s5 = inlined_call_operand.hbm [shape: f32[2,16], index: 5, kind: output, shape index: {}]  }
   0x1   :  { %11 = vsyncpa [#allocation3], 0  ;;  %s26_s20 = sshll.u32 %s2595_s4, 4  ;;  %s27_s20 = int_to_ptr.vmem [resolvable:$true] %s26_s20 }
   0x2   :  { %s1846_s21 = scalar_lea.vmem %s27_s20, 16  ;;  %p1851_p1 = scmp.lt.s32.totalorder %s27_s20, %s27_s20 }
   0x3   :  { %p1847_p0 = scmp.ne.s32.totalorder %s27_s20, %s1846_s21  ;;  %p1852_p2 = scmp.lt.s32.totalorder %s1846_s21, %s1846_s21 }
   0x5   :  { %p1853_p3 = por %p1852_p2, %p1851_p1 }
   0x7   :  { %p1854_p4 = pnand %p1853_p3, %p1847_p0 }
   0x9   :  { %1857 = shalt.err (!%p1854_p4)
}
   0xa   :  { %s1882_s22 = smov [#allocation2]  }
   0xb   :  { %29 = dma.vmem_to_smem %s27_s20, 16, %s1882_s22, [#allocation4]  }
   0xc   :  { %1878 = dma.done.wait [#allocation4], 16  }
   0xd   :  { %1879 = vsyncadd [#allocation4], 4294967280 }
   0xe   :  { %33 = sfence }
   0xf   :  { %v40_v0 = vld [vmem:[%s2593_s2 + $0x8] sm:$0xff]  ;;  %v64_v1 = vlaneseq  ;;  %v1883_v2 = vmov 0.0   ;;  %v39_v3 = vld [vmem:[%s2593_s2] sm:$0xff]  ;;  %s1535_s26 = sld [smem:[#allocation2 + $0x2]]  ;;  %vm1884_vm0 = vmmov 0   ;;  %v36_v15 = vld [vmem:[%s2591_s0 + $0x10] sm:$0xff] }
  0x10   :  { %1604 = vmatprep.subr.mxu0 %v1883_v2  ;;  %1617 = vmatprep.subr.mxu1 %v1883_v2  ;;  %s1536_s27 = sld [smem:[#allocation2 + $0x3]]  ;;  %v1885_v4 = vmov 1966171168   ;;  %v38_v7 = vld [vmem:[%s2592_s1] sm:$0x3]  ;;  %vm113_vm1 = vcmask 1046528  }
  0x11   :  { %1605 = vmatpush3.msra.mxu0 %v40_v0  ;;  %1619 = vmatpush3.msra.mxu1 %v40_v0  ;;  %v62_v5 = vunpack.c.l.s4 %v1885_v4  ;;  %s93_s28 = sld [smem:[#allocation2]]  ;;  %v65_v6 = vshrl.u32 %v64_v1, 7  ;;  %v34_v10 = vld [vmem:[%s2591_s0] sm:$0xff]  ;;  %v35_v11 = vld [vmem:[%s2591_s0 + $0x8] sm:$0xf]  ;;  %vm414_vm2 = vcmask 130048  }
  0x12   :  { %1606 = vmatprep.subr.mxu0 %v1883_v2  ;;  %1608 = vmatprep.mubr.msk.f32.mxu0 %vm1884_vm0, %v1883_v2  ;;  %s1549_s29 = sld [smem:[#allocation2 + $0x1]]  ;;  %v1951_v16 = vld [vmem:[%s2591_s0 + $0x18] sm:$0xf]  ;;  %s1886_s4 = smov [#allocation5]   ;;  %vm1518_vm3 = vcmask 123904  }
  0x13   :  { %1607 = vmatpush3.msra.mxu0 %v39_v3  ;;  %1618 = vmatprep.subr.mxu1 %v1883_v2  ;;  %v63_v8 = vunpack.c.0.s8 %v62_v5  ;;  %v85_v24 = vsub.s32 0, %v65_v6  ;;  %s1540_s0 = sld [smem:[#allocation2 + $0x7]]  ;;  %s1526_s25 = sshll.u32 %s1886_s4, 4  ;;  %s1527_s25 = int_to_ptr.vmem [resolvable:$true] %s1526_s25 }
  0x14   :  { %1620 = vmatpush3.msra.mxu1 %v39_v3  ;;  %1611 = vmatprep.mubr.msk.f32.mxu1 %vm1884_vm0, %v1883_v2  ;;  %s1537_s13 = sld [smem:[#allocation2 + $0x4]]  ;;  %p1863_p6 = scmp.lt.s32.totalorder %s1527_s25, %s1527_s25 }
  0x15   :  { %v56_v9 = vstv %s1535_s26  ;;  %v1943_v14 = vsub.s32 %v63_v8, %v65_v6  ;;  %s1543_s16 = sld [smem:[#allocation2 + $0xa]]  ;;  %s1858_s26 = scalar_lea.vmem %s1527_s25, 32 }
  0x16   :  { %v57_v12 = vmul.f32 %v56_v9, %v38_v7  ;;  %v58_v13 = vstv %s1536_s27  ;;  %s1546_s17 = sld [smem:[#allocation2 + $0xd]]  ;;  %p1859_p5 = scmp.ne.s32.totalorder %s1527_s25, %s1858_s26 }
  0x17   :  { %v1953_v19 = vstv %s93_s28  ;;  %s1538_s18 = sld [smem:[#allocation2 + $0x5]]  ;;  %p1864_p7 = scmp.lt.s32.totalorder %s1858_s26, %s1858_s26 }
  0x18   :  { %v59_v17 = vadd.f32 %v58_v13, %v57_v12  ;;  %v104_v18 = vstv %s1549_s29  ;;  %v95_v29 = vmul.f32 %v1953_v19, %v34_v10  ;;  %v96_v31 = vmul.f32 %v1953_v19, %v35_v11  ;;  %s1542_s19 = sld [smem:[#allocation2 + $0x9]] }
  0x19   :  { %v105_v20 = vmul.f32 %v104_v18, %v34_v10  ;;  %v106_v21 = vmul.f32 %v104_v18, %v35_v11  ;;  %v107_v22 = vmul.f32 %v104_v18, %v36_v15  ;;  %v1957_v25 = vmul.f32 %v104_v18, %v1951_v16  ;;  %s1544_s20 = sld [smem:[#allocation2 + $0xb]]  ;;  %p1865_p8 = por %p1864_p7, %p1863_p6 }
  0x1a   :  { %v67_v23 = vrot.slane %v59_v17, %v1943_v14  ;;  %v97_v36 = vmul.f32 %v1953_v19, %v36_v15  ;;  %s1548_s21 = sld [smem:[#allocation2 + $0xf]] }
  0x1b   :  { %v114_v26 = vrot.slane %v105_v20, 1  ;;  %v115_v27 = vrot.slane %v106_v21, 1  ;;  %v117_v32 = vrot.slane %v107_v22, 1  ;;  %v118_v33 = vrot.slane %v1957_v25, 1  ;;  %s1547_s22 = sld [smem:[#allocation2 + $0xe]]  ;;  %p1866_p9 = pnand %p1865_p8, %p1859_p5 }
  0x1c   :  { %v75_v28 = vrot.slane %v67_v23, %v1943_v14  ;;  %v68_v30 = vcombine.high %v67_v23, %v67_v23  ;;  %s1539_s23 = sld [smem:[#allocation2 + $0x6]] }
  0x1d   :  { %v116_v37 = vsel %vm113_vm1, %v114_v26, %v115_v27  ;;  %v119_v41 = vsel %vm113_vm1, %v117_v32, %v118_v33  ;;  %s1545_s24 = sld [smem:[#allocation2 + $0xc]] }
  0x1e   :  { %v86_v34 = vrot.slane %v75_v28, %v85_v24  ;;  %v82_v35 = vrot.slane %v68_v30, %v1943_v14 }
  0x20   :  { %v99_v38 = vadd.f32 %v95_v29, %v86_v34  ;;  %v1966_v39 = vrot.slane %v82_v35, %v85_v24  ;;  %v100_v40 = vadd.f32 %v96_v31, %v86_v34 }
  0x22   :  { %v124_v42 = vadd.f32 %v116_v37, %v99_v38  ;;  %v101_v43 = vadd.f32 %v97_v36, %v1966_v39  ;;  %v125_v44 = vadd.f32 %v115_v27, %v100_v40 }
  0x24   :  { %v132_v45 = vcombine.high %v124_v42, %v124_v42  ;;  %v139_v46 = vrot.slane %v124_v42, %v1943_v14  ;;  %v126_v47 = vadd.f32 %v119_v41, %v101_v43  ;;  %v187_v48 = vrot.slane %v125_v44, %v1943_v14  ;;  %v2019_v43 = vld [vmem:[%s2594_s3] sm:$0x3]  ;;  %s1541_s3 = sld [smem:[#allocation2 + $0x8]] }
  0x25   :  { %v2021_v44 = vstv %s1540_s0 }
  0x26   :  { %v146_v49 = vrot.slane %v132_v45, %v1943_v14  ;;  %v147_v50 = vcombine.high %v139_v46, %v139_v46  ;;  %v155_v51 = vrot.slane %v139_v46, %v1943_v14  ;;  %v188_v52 = vcombine.high %v187_v48, %v187_v48 }
  0x27   :  { %v195_v53 = vrot.slane %v187_v48, %v1943_v14  ;;  %v204_v54 = vcombine.high %v126_v47, %v126_v47  ;;  %v211_v55 = vrot.slane %v126_v47, %v1943_v14  ;;  %v810_v45 = vmul.f32 %v2021_v44, %v2019_v43 }
  0x28   :  { %v148_v56 = vcombine.high %v146_v49, %v146_v49  ;;  %v162_v57 = vrot.slane %v146_v49, %v1943_v14  ;;  %v169_v58 = vrot.slane %v147_v50, %v1943_v14  ;;  %v202_v59 = vrot.slane %v188_v52, %v1943_v14 }
  0x29   :  { %v203_v60 = vcombine.high %v195_v53, %v195_v53  ;;  %v1982_v61 = vrot.slane %v204_v54, %v1943_v14  ;;  %v219_v62 = vcombine.high %v211_v55, %v211_v55  ;;  %v227_v63 = vrot.slane %v211_v55, %v1943_v14 }
  0x2a   :  { %v176_v0 = vrot.slane %v148_v56, %v1943_v14  ;;  %v276_v1 = vcombine.low %v155_v51, %v169_v58  ;;  %v1550_v3 = vcombine.high %v155_v51, %v169_v58  ;;  %v325_v4 = vcombine.low %v195_v53, %v202_v59 }
  0x2b   :  { %v1988_v5 = vrot.slane %v1982_v61, %v1943_v14  ;;  %v241_v6 = vrot.slane %v219_v62, %v1943_v14  ;;  %v249_v7 = vcombine.high %v227_v63, %v227_v63  ;;  %v326_v8 = vcombine.low %v203_v60, %v227_v63 }
  0x2c   :  { %v278_v9 = vcombine.low %v162_v57, %v176_v0  ;;  %v1551_v10 = vcombine.high %v162_v57, %v176_v0  ;;  %v286_v11 = vrot.slane %v276_v1, %v1943_v14  ;;  %v293_v12 = vrot.slane %v1550_v3, %v1943_v14 }
  0x2d   :  { %v251_v13 = vcombine.high %v241_v6, %v241_v6  ;;  %v327_v15 = vcombine.low %v241_v6, %v249_v7  ;;  %v335_v17 = vrot.slane %v325_v4, %v1943_v14  ;;  %v342_v18 = vrot.slane %v326_v8, %v1943_v14 }
  0x2e   :  { %v300_v20 = vrot.slane %v278_v9, %v1943_v14  ;;  %v307_v21 = vrot.slane %v1551_v10, %v1943_v14  ;;  %v308_v22 = vcombine.low %v286_v11, %v293_v12  ;;  %v2029_v46 = vstv %s1537_s13 }
  0x2f   :  { %v328_v23 = vcombine.low %v251_v13, %v1988_v5  ;;  %v349_v24 = vrot.slane %v327_v15, %v1943_v14  ;;  %v357_v26 = vcombine.low %v335_v17, %v342_v18  ;;  %v818_v48 = vrot.slane %v810_v45, %v1943_v14 }
  0x30   :  { %v309_v27 = vcombine.low %v300_v20, %v307_v21  ;;  %v316_v28 = vrot.slane %v308_v22, %v1943_v14  ;;  %v2034_v49 = vstv %s1543_s16  ;;  %v2047_v56 = vstv %s1546_s17 }
  0x31   :  { %v356_v29 = vrot.slane %v328_v23, %v1943_v14  ;;  %v365_v32 = vrot.slane %v357_v26, %v1943_v14  ;;  %v826_v52 = vrot.slane %v818_v48, %v1943_v14  ;;  %v819_v59 = vcombine.high %v818_v48, %v818_v48 }
  0x32   :  { %v323_v30 = vrot.slane %v309_v27, %v1943_v14  ;;  %v98_v1 = vmul.f32 %v1953_v19, %v1951_v16  ;;  %v220_v3 = vcombine.high %v1982_v61, %v1982_v61  ;;  %v250_v8 = vcombine.high %v1988_v5, %v1988_v5 }
  0x33   :  { %v358_v31 = vcombine.low %v349_v24, %v356_v29  ;;  %v833_v63 = vrot.slane %v819_v59, %v1943_v14  ;;  %v2069_v11 = vstv %s1541_s3  ;;  %v2080_v26 = vstv %s1538_s18 }
  0x34   :  { %v324_v34 = vcombine.low %v316_v28, %v323_v30  ;;  %v102_v6 = vadd.f32 %v98_v1, %v1966_v39  ;;  %v248_v7 = vrot.slane %v220_v3, %v1943_v14  ;;  %v854_v5 = vmul.f32 %v2069_v11, %v2019_v43 }
  0x35   :  { %v372_v35 = vrot.slane %v358_v31, %v1943_v14  ;;  %v2084_v29 = vstv %s1542_s19  ;;  %v2102_v59 = vstv %s1547_s22 }
  0x36   :  { %1609 = vmatmul.mubr.msk.f32.vlgmr.msra.gmra.mxu0 %vm414_vm2, %v324_v34  ;;  %v127_v10 = vadd.f32 %v118_v33, %v102_v6  ;;  %v252_v19 = vcombine.high %v248_v7, %v248_v7  ;;  %v374_v61 = vcombine.low %v248_v7, %v250_v8  ;;  %v862_v22 = vrot.slane %v854_v5, %v1943_v14 }
  0x37   :  { %v373_v36 = vcombine.low %v365_v32, %v372_v35 }
  0x38   :  { %v259_v12 = vrot.slane %v127_v10, %v1943_v14  ;;  %v383_v17 = vrot.slane %v374_v61, %v1943_v14  ;;  %v863_v32 = vcombine.high %v862_v22, %v862_v22  ;;  %v870_v45 = vrot.slane %v862_v22, %v1943_v14 }
  0x39   :  { %1612 = vmatmul.mubr.msk.f32.vlgmr.msra.gmra.mxu1 %vm414_vm2, %v373_v36  ;;  %v2090_v36 = vstv %s1544_s20 }
  0x3a   :  { %1614 = vmatprep.mubr.msk.f32.mxu1 %vm1884_vm0, %v1883_v2  ;;  %v260_v39 = vcombine.high %v259_v12, %v259_v12  ;;  %v267_v13 = vrot.slane %v259_v12, %v1943_v14 }
  0x3c   :  { %v274_v15 = vrot.slane %v260_v39, %v1943_v14  ;;  %v275_v25 = vcombine.high %v267_v13, %v267_v13  ;;  %v375_v33 = vcombine.low %v252_v19, %v267_v13 }
  0x3e   :  { %v376_v20 = vcombine.low %v274_v15, %v275_v25  ;;  %v390_v21 = vrot.slane %v375_v33, %v1943_v14 }
  0x40   :  { %v397_v23 = vrot.slane %v376_v20, %v1943_v14  ;;  %v398_v24 = vcombine.low %v383_v17, %v390_v21 }
  0x42   :  { %v405_v30 = vrot.slane %v398_v24, %v1943_v14  ;;  %v412_v31 = vrot.slane %v397_v23, %v1943_v14 }
  0x44   :  { %v413_v35 = vcombine.low %v405_v30, %v412_v31 }
  0x46   :  { %1615 = vmatmul.mubr.msk.f32.gmra.mxu1 %vm414_vm2, %v413_v35 }
  0xf6   :  { %v2008_v37 = vpop.f32.mrf.mxu0 }
  0xf7   :  { %v2014_v41 = vrot.slane %v2008_v37, %v1943_v14 }
  0xf8   :  { %v1610_v38 = vpop.f32.mrf.mxu0 }
  0xf9   :  { %v2010_v40 = vpop.f32.mrf.mxu1  ;;  %v2025_v2 = vrot.slane %v2014_v41, %v1943_v14  ;;  %v898_v38 = vmul.f32 %v2084_v29, %v2019_v43 }
  0xfa   :  { %v2038_v50 = vrot.slane %v2010_v40, %v1943_v14  ;;  %v553_v23 = vcombine.high %v2010_v40, %v2010_v40 }
  0xfb   :  { %v1613_v42 = vpop.f32.mrf.mxu1  ;;  %v672_v47 = vmul.f32 %v2029_v46, %v2025_v2  ;;  %v718_v28 = vmul.f32 %v2080_v26, %v2025_v2 }
  0xfc   :  { %v568_v53 = vcombine.high %v2038_v50, %v2038_v50  ;;  %v2126_v30 = vrot.slane %v553_v23, %v1943_v14 }
  0xfd   :  { %v695_v51 = vadd.f32 %v2034_v49, %v672_v47  ;;  %v741_v42 = vadd.f32 %v2090_v36, %v718_v28  ;;  %v2096_v47 = vstv %s1548_s21 }
  0xfe   :  { %v2045_v55 = vrot.slane %v568_v53, %v1943_v14  ;;  %v900_v53 = vadd.f32 %v2096_v47, %v898_v38  ;;  %v2135_v40 = vrot.slane %v2126_v30, %v1943_v14 }
  0xff   :  { %v836_v54 = vadd.f32 %v826_v52, %v695_v51  ;;  %v877_v51 = vrot.slane %v863_v32, %v1943_v14 }
 0x100   :  { %v2051_v57 = vcombine.high %v2045_v55, %v2045_v55 }
 0x101   :  { %v839_v58 = vadd.f32 %v2047_v56, %v836_v54 }
 0x102   :  { %v683_v60 = vmul.f32 %v2029_v46, %v2051_v57  ;;  %v729_v34 = vmul.f32 %v2080_v26, %v2051_v57 }
 0x103   :  { %v1555_v62 = vmul.f32 -1.442695, %v839_v58  ;;  %v880_v58 = vadd.f32 %v870_v45, %v741_v42 }
 0x104   :  { %v706_v0 = vadd.f32 %v2034_v49, %v683_v60  ;;  %v752_v52 = vadd.f32 %v2090_v36, %v729_v34 }
 0x105   :  { %1626 = vpow2.f32 %v1555_v62  ;;  %v908_v62 = vrot.slane %v900_v53, %v1943_v14 }
 0x106   :  { %v837_v4 = vadd.f32 %v833_v63, %v706_v0  ;;  %v881_v60 = vadd.f32 %v877_v51, %v752_v52  ;;  %v883_v63 = vadd.f32 %v2102_v59, %v880_v58  ;;  %v684_v51 = vmul.f32 %v2029_v46, %v2135_v40 }
 0x107   :  { %v916_v1 = vrot.slane %v908_v62, %v1943_v14  ;;  %v909_v7 = vcombine.high %v908_v62, %v908_v62 }
 0x108   :  { %v840_v9 = vadd.f32 %v2047_v56, %v837_v4  ;;  %v884_v0 = vadd.f32 %v2102_v59, %v881_v60  ;;  %v2108_v4 = vstv %s1539_s23  ;;  %v1557_v6 = vmul.f32 -1.442695, %v883_v63 }
 0x109   :  { %v764_v8 = vmul.f32 %v2108_v4, %v2025_v2  ;;  %v923_v19 = vrot.slane %v909_v7, %v1943_v14  ;;  %v775_v12 = vmul.f32 %v2108_v4, %v2051_v57  ;;  %v707_v62 = vadd.f32 %v2034_v49, %v684_v51 }
 0x10a   :  { %v1556_v16 = vmul.f32 -1.442695, %v840_v9  ;;  %v1558_v9 = vmul.f32 -1.442695, %v884_v0 }
 0x10c   :  { %1628 = vpow2.f32 %v1556_v16  ;;  %v2112_v16 = vstv %s1545_s24 }
 0x10d   :  { %v787_v61 = vadd.f32 %v2112_v16, %v764_v8  ;;  %v798_v5 = vadd.f32 %v2112_v16, %v775_v12 }
 0x112   :  { %v1627_v18 = vpop.eup %1626 }
 0x113   :  { %v847_v27 = vadd.f32 1.0, %v1627_v18 }
 0x115   :  { %1630 = vrcp.f32 %v847_v27  ;;  %v519_v27 = vcombine.high %v2014_v41, %v2014_v41 }
 0x117   :  { %v2130_v32 = vrot.slane %v519_v27, %v1943_v14 }
 0x119   :  { %v1629_v48 = vpop.eup %1628  ;;  %v673_v42 = vmul.f32 %v2029_v46, %v2130_v32  ;;  %v765_v23 = vmul.f32 %v2108_v4, %v2130_v32 }
 0x11a   :  { %v848_v54 = vadd.f32 1.0, %v1629_v48 }
 0x11c   :  { %1632 = vrcp.f32 %v848_v54  ;;  %v696_v54 = vadd.f32 %v2034_v49, %v673_v42 }
 0x11d   :  { %1634 = vpow2.f32 %v1557_v6  ;;  %v719_v6 = vmul.f32 %v2080_v26, %v2130_v32 }
 0x11e   :  { %1636 = vpow2.f32 %v1558_v9  ;;  %v730_v9 = vmul.f32 %v2080_v26, %v2135_v40 }
 0x11f   :  { %v742_v12 = vadd.f32 %v2090_v36, %v719_v6 }
 0x122   :  { %v1631_v3 = vpop.eup %1630 }
 0x123   :  { %v926_v10 = vmul.f32 %v1631_v3, %v916_v1 }
 0x125   :  { %v928_v13 = vadd.f32 %v926_v10, %v787_v61 }
 0x127   :  { %1638 = vtanh.f32 %v928_v13 }
 0x129   :  { %v1633_v39 = vpop.eup %1632 }
 0x12a   :  { %v927_v15 = vmul.f32 %v1633_v39, %v923_v19  ;;  %v1635_v33 = vpop.eup %1634  ;;  %v753_v39 = vadd.f32 %v2090_v36, %v730_v9 }
 0x12b   :  { %v1637_v17 = vpop.eup %1636  ;;  %v891_v18 = vadd.f32 1.0, %v1635_v33 }
 0x12c   :  { %v929_v25 = vadd.f32 %v927_v15, %v798_v5  ;;  %v892_v20 = vadd.f32 1.0, %v1637_v17 }
 0x12e   :  { %1640 = vtanh.f32 %v929_v25 }
 0x12f   :  { %1642 = vrcp.f32 %v891_v18 }
 0x130   :  { %1644 = vrcp.f32 %v892_v20 }
 0x134   :  { %v1639_v21 = vpop.eup %1638 }
 0x13b   :  { %v1641_v22 = vpop.eup %1640 }
 0x13c   :  { %v934_v57 = vcombine.low %v1639_v21, %v1641_v22  ;;  %v1643_v41 = vpop.eup %1642 }
 0x13e   :  { %v941_v24 = vrot.slane %v934_v57, %v1943_v14 }
 0x140   :  { %v948_v28 = vrot.slane %v941_v24, %v1943_v14 }
 0x142   :  { %v950_v31 = vsub.f32 %v2019_v43, %v948_v28  ;;  %v1645_v43 = vpop.eup %1644  ;;  %v776_v28 = vmul.f32 %v2108_v4, %v2135_v40 }
 0x144   :  { %v958_v34 = vrot.slane %v950_v31, %v1943_v14 }
 0x146   :  { %v959_v35 = vcombine.high %v958_v34, %v958_v34  ;;  %v966_v38 = vrot.slane %v958_v34, %v1943_v14 }
 0x148   :  { %v973_v45 = vrot.slane %v959_v35, %v1943_v14  ;;  %v976_v48 = vmul.f32 %v1643_v41, %v966_v38  ;;  %v788_v38 = vadd.f32 %v2112_v16, %v765_v23 }
 0x14a   :  { %v977_v52 = vmul.f32 %v1645_v43, %v973_v45  ;;  %v2143_v53 = vadd.f32 %v1639_v21, %v976_v48  ;;  %v799_v43 = vadd.f32 %v2112_v16, %v776_v28 }
 0x14c   :  { %v2146_v58 = vadd.f32 %v1641_v22, %v977_v52  ;;  %v980_v60 = vmul.f32 %v2143_v53, %v2021_v44  ;;  %v998_v10 = vmul.f32 %v2143_v53, %v2069_v11  ;;  %v1016_v57 = vmul.f32 %v2143_v53, %v2084_v29 }
 0x14e   :  { %v981_v63 = vmul.f32 %v2146_v58, %v2021_v44  ;;  %v982_v0 = vadd.f32 %v980_v60, %v696_v54  ;;  %v999_v61 = vmul.f32 %v2146_v58, %v2069_v11  ;;  %v1000_v13 = vadd.f32 %v998_v10, %v742_v12 }
 0x14f   :  { %v1017_v24 = vmul.f32 %v2146_v58, %v2084_v29  ;;  %v1018_v31 = vadd.f32 %v1016_v57, %v2096_v47 }
 0x150   :  { %v983_v1 = vadd.f32 %v981_v63, %v707_v62  ;;  %v984_v3 = vadd.f32 %v982_v0, %v2047_v56  ;;  %v1001_v5 = vadd.f32 %v999_v61, %v753_v39  ;;  %v1002_v15 = vadd.f32 %v1000_v13, %v2102_v59 }
 0x151   :  { %v1019_v41 = vadd.f32 %v1017_v24, %v2096_v47  ;;  %v569_v62 = vcombine.high %v2126_v30, %v2126_v30  ;;  %v549_v63 = vcombine.high %v2025_v2, %v2025_v2 }
 0x152   :  { %v985_v7 = vadd.f32 %v983_v1, %v2047_v56  ;;  %v1559_v8 = vmul.f32 -1.442695, %v984_v3  ;;  %v1003_v25 = vadd.f32 %v1001_v5, %v2102_v59  ;;  %v1561_v33 = vmul.f32 -1.442695, %v1002_v15 }
 0x153   :  { %v2184_v3 = vrot.slane %v569_v62, %v1943_v14  ;;  %v720_v9 = vmul.f32 %v2080_v26, %v549_v63 }
 0x154   :  { %1646 = vpow2.f32 %v1559_v8  ;;  %v1560_v19 = vmul.f32 -1.442695, %v985_v7  ;;  %v1562_v18 = vmul.f32 -1.442695, %v1003_v25  ;;  %v674_v8 = vmul.f32 %v2029_v46, %v549_v63 }
 0x155   :  { %v685_v30 = vmul.f32 %v2029_v46, %v2184_v3  ;;  %v743_v13 = vadd.f32 %v2090_v36, %v720_v9  ;;  %v731_v57 = vmul.f32 %v2080_v26, %v2184_v3 }
 0x156   :  { %1648 = vpow2.f32 %v1560_v19  ;;  %v697_v39 = vadd.f32 %v2034_v49, %v674_v8 }
 0x157   :  { %1650 = vpow2.f32 %v1561_v33  ;;  %v708_v15 = vadd.f32 %v2034_v49, %v685_v30 }
 0x161   :  { %v1647_v17 = vpop.eup %1646 }
 0x162   :  { %v992_v20 = vadd.f32 1.0, %v1647_v17 }
 0x163   :  { %v1649_v21 = vpop.eup %1648 }
 0x164   :  { %v993_v22 = vadd.f32 1.0, %v1649_v21  ;;  %1652 = vrcp.f32 %v992_v20  ;;  %v1651_v27 = vpop.eup %1650 }
 0x165   :  { %1654 = vpow2.f32 %v1562_v18  ;;  %v1010_v48 = vadd.f32 1.0, %v1651_v27  ;;  %v754_v27 = vadd.f32 %v2090_v36, %v731_v57 }
 0x166   :  { %1656 = vrcp.f32 %v993_v22 }
 0x171   :  { %v1653_v34 = vpop.eup %1652 }
 0x172   :  { %v1655_v35 = vpop.eup %1654  ;;  %v1020_v42 = vmul.f32 %v1653_v34, %v1018_v31 }
 0x173   :  { %v1657_v45 = vpop.eup %1656  ;;  %v1011_v54 = vadd.f32 1.0, %v1655_v35 }
 0x174   :  { %v1021_v51 = vmul.f32 %v1657_v45, %v1019_v41  ;;  %v1022_v52 = vadd.f32 %v1020_v42, %v788_v38 }
 0x176   :  { %v1023_v60 = vadd.f32 %v1021_v51, %v799_v43  ;;  %1658 = vtanh.f32 %v1022_v52  ;;  %v766_v51 = vmul.f32 %v2108_v4, %v549_v63 }
 0x177   :  { %1660 = vrcp.f32 %v1010_v48 }
 0x178   :  { %1662 = vtanh.f32 %v1023_v60  ;;  %v777_v60 = vmul.f32 %v2108_v4, %v2184_v3 }
 0x179   :  { %1664 = vrcp.f32 %v1011_v54 }
 0x17a   :  { %v800_v63 = vadd.f32 %v2112_v16, %v777_v60 }
 0x183   :  { %v1659_v0 = vpop.eup %1658 }
 0x184   :  { %v1661_v1 = vpop.eup %1660  ;;  %v1026_v6 = vsub.f32 %v2143_v53, %v1659_v0 }
 0x185   :  { %v1663_v7 = vpop.eup %1662 }
 0x186   :  { %v1027_v10 = vsub.f32 %v2146_v58, %v1663_v7  ;;  %v1028_v19 = vmul.f32 %v1661_v1, %v1026_v6  ;;  %v1665_v12 = vpop.eup %1664  ;;  %v789_v6 = vadd.f32 %v2112_v16, %v766_v51 }
 0x188   :  { %v1029_v2 = vmul.f32 %v1665_v12, %v1027_v10  ;;  %v2192_v61 = vadd.f32 %v1659_v0, %v1028_v19 }
 0x18a   :  { %v2196_v53 = vadd.f32 %v1663_v7, %v1029_v2  ;;  %v1032_v5 = vmul.f32 %v2192_v61, %v2021_v44  ;;  %v1050_v58 = vmul.f32 %v2192_v61, %v2069_v11  ;;  %v1068_v43 = vmul.f32 %v2192_v61, %v2084_v29 }
 0x18c   :  { %v1033_v25 = vmul.f32 %v2196_v53, %v2021_v44  ;;  %v1034_v33 = vadd.f32 %v1032_v5, %v697_v39  ;;  %v1052_v17 = vadd.f32 %v1050_v58, %v743_v13  ;;  %v1051_v24 = vmul.f32 %v2196_v53, %v2069_v11 }
 0x18d   :  { %v1069_v52 = vmul.f32 %v2196_v53, %v2084_v29  ;;  %v1070_v62 = vadd.f32 %v1068_v43, %v2096_v47  ;;  %v551_v39 = vcombine.high %v2130_v32, %v2130_v32  ;;  %v599_v5 = vcombine.high %v2135_v40, %v2135_v40 }
 0x18e   :  { %v1035_v18 = vadd.f32 %v1033_v25, %v708_v15  ;;  %v1036_v20 = vadd.f32 %v1034_v33, %v2047_v56  ;;  %v1053_v28 = vadd.f32 %v1051_v24, %v754_v27  ;;  %v1054_v31 = vadd.f32 %v1052_v17, %v2102_v59 }
 0x18f   :  { %v1071_v7 = vadd.f32 %v1069_v52, %v2096_v47  ;;  %v675_v33 = vmul.f32 %v2029_v46, %v551_v39  ;;  %v721_v17 = vmul.f32 %v2080_v26, %v551_v39  ;;  %v732_v32 = vmul.f32 %v2080_v26, %v599_v5 }
 0x190   :  { %v1037_v21 = vadd.f32 %v1035_v18, %v2047_v56  ;;  %v1563_v22 = vmul.f32 -1.442695, %v1036_v20  ;;  %v1055_v34 = vadd.f32 %v1053_v28, %v2102_v59  ;;  %v1565_v35 = vmul.f32 -1.442695, %v1054_v31 }
 0x191   :  { %v698_v40 = vadd.f32 %v2034_v49, %v675_v33  ;;  %v755_v31 = vadd.f32 %v2090_v36, %v732_v32 }
 0x192   :  { %1666 = vpow2.f32 %v1563_v22  ;;  %v1564_v23 = vmul.f32 -1.442695, %v1037_v21  ;;  %v1566_v41 = vmul.f32 -1.442695, %v1055_v34  ;;  %v686_v22 = vmul.f32 %v2029_v46, %v599_v5 }
 0x194   :  { %1668 = vpow2.f32 %v1564_v23  ;;  %v709_v28 = vadd.f32 %v2034_v49, %v686_v22 }
 0x195   :  { %1670 = vpow2.f32 %v1565_v35 }
 0x19f   :  { %v1667_v38 = vpop.eup %1666 }
 0x1a0   :  { %v1044_v42 = vadd.f32 1.0, %v1667_v38 }
 0x1a1   :  { %v1669_v45 = vpop.eup %1668 }
 0x1a2   :  { %v1045_v48 = vadd.f32 1.0, %v1669_v45  ;;  %1672 = vrcp.f32 %v1044_v42  ;;  %v1671_v54 = vpop.eup %1670 }
 0x1a3   :  { %1674 = vpow2.f32 %v1566_v41  ;;  %v1062_v10 = vadd.f32 1.0, %v1671_v54  ;;  %v2253_v54 = vpop.f32.mrf.mxu1 }
 0x1a4   :  { %1676 = vrcp.f32 %v1045_v48 }
 0x1af   :  { %v1673_v0 = vpop.eup %1672 }
 0x1b0   :  { %v1675_v1 = vpop.eup %1674  ;;  %v1072_v8 = vmul.f32 %v1673_v0, %v1070_v62  ;;  %v1616_v62 = vpop.f32.mrf.mxu1 }
 0x1b1   :  { %v1677_v9 = vpop.eup %1676  ;;  %v1063_v30 = vadd.f32 1.0, %v1675_v1 }
 0x1b2   :  { %v1073_v19 = vmul.f32 %v1677_v9, %v1071_v7  ;;  %v1074_v12 = vadd.f32 %v1072_v8, %v789_v6 }
 0x1b4   :  { %v1075_v2 = vadd.f32 %v1073_v19, %v800_v63  ;;  %1678 = vtanh.f32 %v1074_v12  ;;  %v767_v19 = vmul.f32 %v2108_v4, %v551_v39 }
 0x1b5   :  { %1680 = vrcp.f32 %v1062_v10 }
 0x1b6   :  { %1682 = vtanh.f32 %v1075_v2  ;;  %v778_v2 = vmul.f32 %v2108_v4, %v599_v5  ;;  %v504_v5 = vcombine.high %v2008_v37, %v2008_v37 }
 0x1b7   :  { %1684 = vrcp.f32 %v1063_v30 }
 0x1c1   :  { %v1679_v13 = vpop.eup %1678 }
 0x1c2   :  { %v1681_v58 = vpop.eup %1680  ;;  %v1078_v15 = vsub.f32 %v2192_v61, %v1679_v13  ;;  %v744_v61 = vadd.f32 %v2090_v36, %v721_v17 }
 0x1c3   :  { %v1683_v25 = vpop.eup %1682 }
 0x1c4   :  { %v1079_v18 = vsub.f32 %v2196_v53, %v1683_v25  ;;  %v1080_v20 = vmul.f32 %v1681_v58, %v1078_v15  ;;  %v1685_v21 = vpop.eup %1684 }
 0x1c6   :  { %v1081_v57 = vmul.f32 %v1685_v21, %v1079_v18  ;;  %v2235_v23 = vadd.f32 %v1679_v13, %v1080_v20  ;;  %v801_v21 = vadd.f32 %v2112_v16, %v778_v2 }
 0x1c8   :  { %v2239_v24 = vadd.f32 %v1683_v25, %v1081_v57  ;;  %v1084_v27 = vmul.f32 %v2235_v23, %v2021_v44  ;;  %v1102_v53 = vmul.f32 %v2235_v23, %v2069_v11  ;;  %v1120_v63 = vmul.f32 %v2235_v23, %v2084_v29 }
 0x1c9   :  { %v790_v25 = vadd.f32 %v2112_v16, %v767_v19 }
 0x1ca   :  { %v1085_v34 = vmul.f32 %v2239_v24, %v2021_v44  ;;  %v1086_v35 = vadd.f32 %v1084_v27, %v698_v40  ;;  %v1103_v38 = vmul.f32 %v2239_v24, %v2069_v11  ;;  %v1104_v41 = vadd.f32 %v1102_v53, %v744_v61 }
 0x1cb   :  { %v1121_v12 = vmul.f32 %v2239_v24, %v2084_v29  ;;  %v1122_v13 = vadd.f32 %v1120_v63, %v2096_v47  ;;  %v2270_v40 = vrot.slane %v504_v5, %v1943_v14  ;;  %v601_v53 = vcombine.high %v2184_v3, %v2184_v3 }
 0x1cc   :  { %v1087_v42 = vadd.f32 %v1085_v34, %v709_v28  ;;  %v1088_v45 = vadd.f32 %v1086_v35, %v2047_v56  ;;  %v1105_v48 = vadd.f32 %v1103_v38, %v755_v31  ;;  %v1106_v60 = vadd.f32 %v1104_v41, %v2102_v59 }
 0x1cd   :  { %v1123_v33 = vadd.f32 %v1121_v12, %v2096_v47  ;;  %v2274_v61 = vrot.slane %v2270_v40, %v1943_v14 }
 0x1ce   :  { %v1089_v43 = vadd.f32 %v1087_v42, %v2047_v56  ;;  %v1567_v51 = vmul.f32 -1.442695, %v1088_v45  ;;  %v1107_v0 = vadd.f32 %v1105_v48, %v2102_v59  ;;  %v1569_v1 = vmul.f32 -1.442695, %v1106_v60 }
 0x1cf   :  { %v676_v35 = vmul.f32 %v2029_v46, %v2274_v61  ;;  %v722_v37 = vmul.f32 %v2080_v26, %v2274_v61  ;;  %v687_v45 = vmul.f32 %v2029_v46, %v601_v53  ;;  %v733_v48 = vmul.f32 %v2080_v26, %v601_v53 }
 0x1d0   :  { %1686 = vpow2.f32 %v1567_v51  ;;  %v1568_v52 = vmul.f32 -1.442695, %v1089_v43  ;;  %v1570_v7 = vmul.f32 -1.442695, %v1107_v0 }
 0x1d1   :  { %v745_v51 = vadd.f32 %v2090_v36, %v722_v37  ;;  %v710_v62 = vadd.f32 %v2034_v49, %v687_v45  ;;  %v756_v0 = vadd.f32 %v2090_v36, %v733_v48 }
 0x1d2   :  { %1688 = vpow2.f32 %v1568_v52 }
 0x1d3   :  { %1690 = vpow2.f32 %v1569_v1 }
 0x1dd   :  { %v1687_v6 = vpop.eup %1686 }
 0x1de   :  { %v1096_v8 = vadd.f32 1.0, %v1687_v6 }
 0x1df   :  { %v1689_v9 = vpop.eup %1688 }
 0x1e0   :  { %v1097_v10 = vadd.f32 1.0, %v1689_v9  ;;  %1692 = vrcp.f32 %v1096_v8  ;;  %v1691_v30 = vpop.eup %1690 }
 0x1e1   :  { %1694 = vpow2.f32 %v1570_v7  ;;  %v1114_v20 = vadd.f32 1.0, %v1691_v30 }
 0x1e2   :  { %1696 = vrcp.f32 %v1097_v10 }
 0x1ed   :  { %v1693_v58 = vpop.eup %1692 }
 0x1ee   :  { %v1695_v15 = vpop.eup %1694  ;;  %v1124_v17 = vmul.f32 %v1693_v58, %v1122_v13 }
 0x1ef   :  { %v1697_v18 = vpop.eup %1696  ;;  %v1115_v32 = vadd.f32 1.0, %v1695_v15 }
 0x1f0   :  { %v1125_v39 = vmul.f32 %v1697_v18, %v1123_v33  ;;  %v1126_v22 = vadd.f32 %v1124_v17, %v790_v25 }
 0x1f2   :  { %v1127_v57 = vadd.f32 %v1125_v39, %v801_v21  ;;  %1698 = vtanh.f32 %v1126_v22  ;;  %v768_v21 = vmul.f32 %v2108_v4, %v2274_v61 }
 0x1f3   :  { %1700 = vrcp.f32 %v1114_v20 }
 0x1f4   :  { %1702 = vtanh.f32 %v1127_v57 }
 0x1f5   :  { %1704 = vrcp.f32 %v1115_v32  ;;  %v779_v32 = vmul.f32 %v2108_v4, %v601_v53  ;;  %v520_v53 = vcombine.high %v2270_v40, %v2270_v40 }
 0x1ff   :  { %v1699_v27 = vpop.eup %1698 }
 0x200   :  { %v1701_v28 = vpop.eup %1700  ;;  %v1130_v31 = vsub.f32 %v2235_v23, %v1699_v27  ;;  %v699_v23 = vadd.f32 %v2034_v49, %v676_v35 }
 0x201   :  { %v1703_v34 = vpop.eup %1702 }
 0x202   :  { %v1131_v38 = vsub.f32 %v2239_v24, %v1703_v34  ;;  %v1132_v41 = vmul.f32 %v1701_v28, %v1130_v31  ;;  %v1705_v42 = vpop.eup %1704  ;;  %v791_v28 = vadd.f32 %v2112_v16, %v768_v21 }
 0x204   :  { %v1133_v43 = vmul.f32 %v1705_v42, %v1131_v38  ;;  %v2286_v3 = vadd.f32 %v1699_v27, %v1132_v41  ;;  %v802_v38 = vadd.f32 %v2112_v16, %v779_v32 }
 0x206   :  { %v2290_v52 = vadd.f32 %v1703_v34, %v1133_v43  ;;  %v1136_v60 = vmul.f32 %v2286_v3, %v2021_v44  ;;  %v1154_v24 = vmul.f32 %v2286_v3, %v2069_v11  ;;  %v1172_v20 = vmul.f32 %v2286_v3, %v2084_v29 }
 0x207   :  { %v2321_v43 = vrot.slane %v2253_v54, %v1943_v14 }
 0x208   :  { %v1137_v1 = vmul.f32 %v2290_v52, %v2021_v44  ;;  %v1138_v6 = vadd.f32 %v1136_v60, %v699_v23  ;;  %v1155_v7 = vmul.f32 %v2290_v52, %v2069_v11  ;;  %v1156_v8 = vadd.f32 %v1154_v24, %v745_v51 }
 0x209   :  { %v1173_v39 = vmul.f32 %v2290_v52, %v2084_v29  ;;  %v1174_v57 = vadd.f32 %v1172_v20, %v2096_v47  ;;  %v2324_v23 = vrot.slane %v520_v53, %v1943_v14  ;;  %v2328_v51 = vrot.slane %v2321_v43, %v1943_v14 }
 0x20a   :  { %v1139_v9 = vadd.f32 %v1137_v1, %v710_v62  ;;  %v1140_v10 = vadd.f32 %v1138_v6, %v2047_v56  ;;  %v1157_v63 = vadd.f32 %v1155_v7, %v756_v0  ;;  %v1158_v2 = vadd.f32 %v1156_v8, %v2102_v59 }
 0x20b   :  { %v1175_v31 = vadd.f32 %v1173_v39, %v2096_v47  ;;  %v677_v1 = vmul.f32 %v2029_v46, %v2324_v23  ;;  %v723_v40 = vmul.f32 %v2080_v26, %v2324_v23  ;;  %v688_v7 = vmul.f32 %v2029_v46, %v2328_v51 }
 0x20c   :  { %v1141_v19 = vadd.f32 %v1139_v9, %v2047_v56  ;;  %v1571_v12 = vmul.f32 -1.442695, %v1140_v10  ;;  %v1159_v13 = vadd.f32 %v1157_v63, %v2102_v59  ;;  %v1573_v58 = vmul.f32 -1.442695, %v1158_v2 }
 0x20d   :  { %v734_v10 = vmul.f32 %v2080_v26, %v2328_v51  ;;  %v780_v53 = vmul.f32 %v2108_v4, %v2328_v51 }
 0x20e   :  { %1706 = vpow2.f32 %v1571_v12  ;;  %v1572_v30 = vmul.f32 -1.442695, %v1141_v19  ;;  %v1574_v25 = vmul.f32 -1.442695, %v1159_v13  ;;  %v700_v19 = vadd.f32 %v2034_v49, %v677_v1 }
 0x20f   :  { %v746_v12 = vadd.f32 %v2090_v36, %v723_v40  ;;  %v711_v13 = vadd.f32 %v2034_v49, %v688_v7 }
 0x210   :  { %1708 = vpow2.f32 %v1572_v30 }
 0x211   :  { %1710 = vpow2.f32 %v1573_v58  ;;  %v757_v58 = vadd.f32 %v2090_v36, %v734_v10 }
 0x21b   :  { %v1707_v15 = vpop.eup %1706 }
 0x21c   :  { %v1148_v33 = vadd.f32 1.0, %v1707_v15 }
 0x21d   :  { %v1709_v17 = vpop.eup %1708 }
 0x21e   :  { %v1149_v18 = vadd.f32 1.0, %v1709_v17  ;;  %1712 = vrcp.f32 %v1148_v33  ;;  %v1711_v22 = vpop.eup %1710 }
 0x21f   :  { %1714 = vpow2.f32 %v1574_v25  ;;  %v1166_v37 = vadd.f32 1.0, %v1711_v22 }
 0x220   :  { %1716 = vrcp.f32 %v1149_v18 }
 0x22b   :  { %v1713_v5 = vpop.eup %1712 }
 0x22c   :  { %v1715_v27 = vpop.eup %1714  ;;  %v1176_v34 = vmul.f32 %v1713_v5, %v1174_v57 }
 0x22d   :  { %v1717_v35 = vpop.eup %1716  ;;  %v1167_v45 = vadd.f32 1.0, %v1715_v27 }
 0x22e   :  { %v1177_v41 = vmul.f32 %v1717_v35, %v1175_v31  ;;  %v1178_v42 = vadd.f32 %v1176_v34, %v791_v28 }
 0x230   :  { %v1179_v48 = vadd.f32 %v1177_v41, %v802_v38  ;;  %1718 = vtanh.f32 %v1178_v42  ;;  %v769_v41 = vmul.f32 %v2108_v4, %v2324_v23 }
 0x231   :  { %1720 = vrcp.f32 %v1166_v37 }
 0x232   :  { %1722 = vtanh.f32 %v1179_v48 }
 0x233   :  { %1724 = vrcp.f32 %v1167_v45 }
 0x23d   :  { %v1719_v60 = vpop.eup %1718 }
 0x23e   :  { %v1721_v24 = vpop.eup %1720  ;;  %v1182_v62 = vsub.f32 %v2286_v3, %v1719_v60 }
 0x23f   :  { %v1723_v0 = vpop.eup %1722 }
 0x240   :  { %v1184_v6 = vmul.f32 %v1721_v24, %v1182_v62  ;;  %v1183_v8 = vsub.f32 %v2290_v52, %v1723_v0  ;;  %v1725_v9 = vpop.eup %1724  ;;  %v792_v62 = vadd.f32 %v2112_v16, %v769_v41 }
 0x242   :  { %v2340_v63 = vadd.f32 %v1719_v60, %v1184_v6  ;;  %v1185_v3 = vmul.f32 %v1725_v9, %v1183_v8  ;;  %v803_v8 = vadd.f32 %v2112_v16, %v780_v53 }
 0x244   :  { %v1188_v30 = vmul.f32 %v2340_v63, %v2021_v44  ;;  %v1206_v2 = vmul.f32 %v2340_v63, %v2069_v11  ;;  %v2349_v52 = vadd.f32 %v1723_v0, %v1185_v3  ;;  %v1224_v38 = vmul.f32 %v2340_v63, %v2084_v29 }
 0x246   :  { %v1190_v15 = vadd.f32 %v1188_v30, %v700_v19  ;;  %v1208_v25 = vadd.f32 %v1206_v2, %v746_v12  ;;  %v1189_v33 = vmul.f32 %v2349_v52, %v2021_v44  ;;  %v1207_v17 = vmul.f32 %v2349_v52, %v2069_v11 }
 0x247   :  { %v1225_v42 = vmul.f32 %v2349_v52, %v2084_v29  ;;  %v1226_v48 = vadd.f32 %v1224_v38, %v2096_v47  ;;  %v617_v19 = vcombine.high %v2321_v43, %v2321_v43  ;;  %v550_v12 = vcombine.high %v2274_v61, %v2274_v61 }
 0x248   :  { %v1192_v18 = vadd.f32 %v1190_v15, %v2047_v56  ;;  %v1191_v20 = vadd.f32 %v1189_v33, %v711_v13  ;;  %v1209_v21 = vadd.f32 %v1207_v17, %v757_v58  ;;  %v1210_v57 = vadd.f32 %v1208_v25, %v2102_v59 }
 0x249   :  { %v1227_v1 = vadd.f32 %v1225_v42, %v2096_v47  ;;  %v2378_v58 = vrot.slane %v617_v19, %v1943_v14  ;;  %v678_v25 = vmul.f32 %v2029_v46, %v550_v12  ;;  %v724_v33 = vmul.f32 %v2080_v26, %v550_v12 }
 0x24a   :  { %v1575_v39 = vmul.f32 -1.442695, %v1192_v18  ;;  %v1193_v22 = vadd.f32 %v1191_v20, %v2047_v56  ;;  %v1211_v5 = vadd.f32 %v1209_v21, %v2102_v59  ;;  %v1577_v27 = vmul.f32 -1.442695, %v1210_v57 }
 0x24b   :  { %v689_v61 = vmul.f32 %v2029_v46, %v2378_v58  ;;  %v781_v19 = vmul.f32 %v2108_v4, %v2378_v58 }
 0x24c   :  { %1726 = vpow2.f32 %v1575_v39  ;;  %v1576_v32 = vmul.f32 -1.442695, %v1193_v22  ;;  %v1578_v31 = vmul.f32 -1.442695, %v1211_v5  ;;  %v735_v39 = vmul.f32 %v2080_v26, %v2378_v58 }
 0x24d   :  { %v747_v22 = vadd.f32 %v2090_v36, %v724_v33 }
 0x24e   :  { %1728 = vpow2.f32 %v1576_v32 }
 0x24f   :  { %1730 = vpow2.f32 %v1577_v27 }
 0x259   :  { %v1727_v28 = vpop.eup %1726 }
 0x25a   :  { %v1200_v34 = vadd.f32 1.0, %v1727_v28  ;;  %v712_v28 = vadd.f32 %v2034_v49, %v689_v61 }
 0x25b   :  { %v1729_v35 = vpop.eup %1728 }
 0x25c   :  { %1732 = vrcp.f32 %v1200_v34  ;;  %v1201_v37 = vadd.f32 1.0, %v1729_v35  ;;  %v1731_v45 = vpop.eup %1730  ;;  %v758_v34 = vadd.f32 %v2090_v36, %v735_v39 }
 0x25d   :  { %1734 = vpow2.f32 %v1578_v31  ;;  %v1218_v6 = vadd.f32 1.0, %v1731_v45 }
 0x25e   :  { %1736 = vrcp.f32 %v1201_v37 }
 0x269   :  { %v1733_v60 = vpop.eup %1732 }
 0x26a   :  { %v1735_v24 = vpop.eup %1734  ;;  %v1228_v0 = vmul.f32 %v1733_v60, %v1226_v48 }
 0x26b   :  { %v1737_v40 = vpop.eup %1736  ;;  %v1219_v10 = vadd.f32 1.0, %v1735_v24 }
 0x26c   :  { %v1230_v7 = vadd.f32 %v1228_v0, %v792_v62  ;;  %v1229_v9 = vmul.f32 %v1737_v40, %v1227_v1 }
 0x26e   :  { %1738 = vtanh.f32 %v1230_v7  ;;  %v1231_v3 = vadd.f32 %v1229_v9, %v803_v8  ;;  %v770_v8 = vmul.f32 %v2108_v4, %v550_v12  ;;  %v804_v12 = vadd.f32 %v2112_v16, %v781_v19 }
 0x26f   :  { %1740 = vrcp.f32 %v1218_v6 }
 0x270   :  { %1742 = vtanh.f32 %v1231_v3 }
 0x271   :  { %1744 = vrcp.f32 %v1219_v10 }
 0x27b   :  { %v1739_v30 = vpop.eup %1738 }
 0x27c   :  { %v1741_v2 = vpop.eup %1740  ;;  %v1234_v13 = vsub.f32 %v2340_v63, %v1739_v30  ;;  %v701_v63 = vadd.f32 %v2034_v49, %v678_v25 }
 0x27d   :  { %v1743_v15 = vpop.eup %1742 }
 0x27e   :  { %v1236_v17 = vmul.f32 %v1741_v2, %v1234_v13  ;;  %v1235_v18 = vsub.f32 %v2349_v52, %v1743_v15  ;;  %v1745_v20 = vpop.eup %1744  ;;  %v793_v13 = vadd.f32 %v2112_v16, %v770_v8 }
 0x280   :  { %v2383_v43 = vadd.f32 %v1739_v30, %v1236_v17  ;;  %v1237_v21 = vmul.f32 %v1745_v20, %v1235_v18 }
 0x282   :  { %v1240_v32 = vmul.f32 %v2383_v43, %v2021_v44  ;;  %v1258_v52 = vmul.f32 %v2383_v43, %v2069_v11  ;;  %v2395_v57 = vadd.f32 %v1743_v15, %v1237_v21  ;;  %v1276_v7 = vmul.f32 %v2383_v43, %v2084_v29 }
 0x284   :  { %v1242_v5 = vadd.f32 %v1240_v32, %v701_v63  ;;  %v1260_v27 = vadd.f32 %v1258_v52, %v747_v22  ;;  %v1241_v31 = vmul.f32 %v2395_v57, %v2021_v44  ;;  %v1259_v35 = vmul.f32 %v2395_v57, %v2069_v11 }
 0x285   :  { %v1277_v9 = vmul.f32 %v2395_v57, %v2084_v29  ;;  %v1278_v3 = vadd.f32 %v1276_v7, %v2096_v47  ;;  %v552_v63 = vcombine.high %v2324_v23, %v2324_v23  ;;  %v647_v52 = vcombine.high %v2328_v51, %v2328_v51 }
 0x286   :  { %v1244_v37 = vadd.f32 %v1242_v5, %v2047_v56  ;;  %v1243_v38 = vadd.f32 %v1241_v31, %v712_v28  ;;  %v1261_v41 = vadd.f32 %v1259_v35, %v758_v34  ;;  %v1262_v53 = vadd.f32 %v1260_v27, %v2102_v59 }
 0x287   :  { %v1279_v25 = vadd.f32 %v1277_v9, %v2096_v47  ;;  %v679_v27 = vmul.f32 %v2029_v46, %v552_v63  ;;  %v725_v28 = vmul.f32 %v2080_v26, %v552_v63  ;;  %v690_v23 = vmul.f32 %v2029_v46, %v647_v52 }
 0x288   :  { %v1579_v42 = vmul.f32 -1.442695, %v1244_v37  ;;  %v1245_v45 = vadd.f32 %v1243_v38, %v2047_v56  ;;  %v1263_v60 = vadd.f32 %v1261_v41, %v2102_v59  ;;  %v1581_v24 = vmul.f32 -1.442695, %v1262_v53 }
 0x289   :  { %v702_v41 = vadd.f32 %v2034_v49, %v679_v27  ;;  %v748_v51 = vadd.f32 %v2090_v36, %v725_v28 }
 0x28a   :  { %1746 = vpow2.f32 %v1579_v42  ;;  %v1580_v48 = vmul.f32 -1.442695, %v1245_v45  ;;  %v1582_v0 = vmul.f32 -1.442695, %v1263_v60  ;;  %v713_v60 = vadd.f32 %v2034_v49, %v690_v23 }
 0x28c   :  { %1748 = vpow2.f32 %v1580_v48 }
 0x28d   :  { %1750 = vpow2.f32 %v1581_v24 }
 0x297   :  { %v1747_v62 = vpop.eup %1746 }
 0x298   :  { %v1252_v1 = vadd.f32 1.0, %v1747_v62 }
 0x299   :  { %v1749_v40 = vpop.eup %1748 }
 0x29a   :  { %1752 = vrcp.f32 %v1252_v1  ;;  %v1253_v6 = vadd.f32 1.0, %v1749_v40  ;;  %v1751_v10 = vpop.eup %1750 }
 0x29b   :  { %1754 = vpow2.f32 %v1582_v0  ;;  %v1270_v17 = vadd.f32 1.0, %v1751_v10 }
 0x29c   :  { %1756 = vrcp.f32 %v1253_v6 }
 0x2a7   :  { %v1753_v30 = vpop.eup %1752 }
 0x2a8   :  { %v1755_v2 = vpop.eup %1754  ;;  %v1280_v15 = vmul.f32 %v1753_v30, %v1278_v3 }
 0x2a9   :  { %v1757_v33 = vpop.eup %1756  ;;  %v1271_v61 = vadd.f32 1.0, %v1755_v2 }
 0x2aa   :  { %v1282_v18 = vadd.f32 %v1280_v15, %v793_v13  ;;  %v1281_v20 = vmul.f32 %v1757_v33, %v1279_v25 }
 0x2ac   :  { %1758 = vtanh.f32 %v1282_v18  ;;  %v1283_v21 = vadd.f32 %v1281_v20, %v804_v12 }
 0x2ad   :  { %1760 = vrcp.f32 %v1270_v17  ;;  %v771_v17 = vmul.f32 %v2108_v4, %v552_v63 }
 0x2ae   :  { %1762 = vtanh.f32 %v1283_v21 }
 0x2af   :  { %1764 = vrcp.f32 %v1271_v61  ;;  %v782_v61 = vmul.f32 %v2108_v4, %v647_v52 }
 0x2b1   :  { %v805_v63 = vadd.f32 %v2112_v16, %v782_v61 }
 0x2b9   :  { %v1759_v39 = vpop.eup %1758 }
 0x2ba   :  { %v1761_v22 = vpop.eup %1760  ;;  %v1286_v32 = vsub.f32 %v2383_v43, %v1759_v39  ;;  %v736_v43 = vmul.f32 %v2080_v26, %v647_v52  ;;  %v2460_v52 = vrot.slane %v2038_v50, %v1943_v14 }
 0x2bb   :  { %v1763_v5 = vpop.eup %1762 }
 0x2bc   :  { %v1288_v31 = vmul.f32 %v1761_v22, %v1286_v32  ;;  %v1287_v34 = vsub.f32 %v2395_v57, %v1763_v5  ;;  %v1765_v35 = vpop.eup %1764  ;;  %v759_v62 = vadd.f32 %v2090_v36, %v736_v43  ;;  %v794_v22 = vadd.f32 %v2112_v16, %v771_v17 }
 0x2be   :  { %v2426_v37 = vadd.f32 %v1759_v39, %v1288_v31  ;;  %v1289_v38 = vmul.f32 %v1765_v35, %v1287_v34 }
 0x2c0   :  { %v1292_v42 = vmul.f32 %v2426_v37, %v2021_v44  ;;  %v1310_v45 = vmul.f32 %v2426_v37, %v2069_v11  ;;  %v2436_v48 = vadd.f32 %v1763_v5, %v1289_v38  ;;  %v1328_v33 = vmul.f32 %v2426_v37, %v2084_v29 }
 0x2c2   :  { %v1294_v57 = vadd.f32 %v1292_v42, %v702_v41  ;;  %v1312_v53 = vadd.f32 %v1310_v45, %v748_v51  ;;  %v1293_v24 = vmul.f32 %v2436_v48, %v2021_v44  ;;  %v1311_v0 = vmul.f32 %v2436_v48, %v2069_v11 }
 0x2c3   :  { %v1329_v18 = vmul.f32 %v2436_v48, %v2084_v29  ;;  %v1330_v20 = vadd.f32 %v1328_v33, %v2096_v47  ;;  %v648_v51 = vcombine.high %v2378_v58, %v2378_v58  ;;  %v680_v45 = vmul.f32 %v2029_v46, %v2460_v52 }
 0x2c4   :  { %v1296_v1 = vadd.f32 %v1294_v57, %v2047_v56  ;;  %v1295_v40 = vadd.f32 %v1293_v24, %v713_v60  ;;  %v1313_v6 = vadd.f32 %v1311_v0, %v759_v62  ;;  %v1314_v10 = vadd.f32 %v1312_v53, %v2102_v59 }
 0x2c5   :  { %v1331_v5 = vadd.f32 %v1329_v18, %v2096_v47  ;;  %v726_v57 = vmul.f32 %v2080_v26, %v2460_v52  ;;  %v691_v62 = vmul.f32 %v2029_v46, %v648_v51  ;;  %v737_v58 = vmul.f32 %v2080_v26, %v648_v51 }
 0x2c6   :  { %v1583_v7 = vmul.f32 -1.442695, %v1296_v1  ;;  %v1297_v8 = vadd.f32 %v1295_v40, %v2047_v56  ;;  %v1315_v3 = vadd.f32 %v1313_v6, %v2102_v59  ;;  %v1585_v19 = vmul.f32 -1.442695, %v1314_v10 }
 0x2c7   :  { %v749_v1 = vadd.f32 %v2090_v36, %v726_v57 }
 0x2c8   :  { %1766 = vpow2.f32 %v1583_v7  ;;  %v1584_v9 = vmul.f32 -1.442695, %v1297_v8  ;;  %v1586_v2 = vmul.f32 -1.442695, %v1315_v3  ;;  %v760_v3 = vadd.f32 %v2090_v36, %v737_v58 }
 0x2ca   :  { %1768 = vpow2.f32 %v1584_v9  ;;  %v714_v9 = vadd.f32 %v2034_v49, %v691_v62 }
 0x2cb   :  { %1770 = vpow2.f32 %v1585_v19 }
 0x2d5   :  { %v1767_v30 = vpop.eup %1766 }
 0x2d6   :  { %v1304_v13 = vadd.f32 1.0, %v1767_v30 }
 0x2d7   :  { %v1769_v15 = vpop.eup %1768 }
 0x2d8   :  { %1772 = vrcp.f32 %v1304_v13  ;;  %v1305_v25 = vadd.f32 1.0, %v1769_v15  ;;  %v1771_v12 = vpop.eup %1770 }
 0x2d9   :  { %1774 = vpow2.f32 %v1586_v2  ;;  %v1322_v28 = vadd.f32 1.0, %v1771_v12 }
 0x2da   :  { %1776 = vrcp.f32 %v1305_v25 }
 0x2e5   :  { %v1773_v21 = vpop.eup %1772 }
 0x2e6   :  { %v1775_v39 = vpop.eup %1774  ;;  %v1332_v32 = vmul.f32 %v1773_v21, %v1330_v20 }
 0x2e7   :  { %v1777_v27 = vpop.eup %1776  ;;  %v1323_v35 = vadd.f32 1.0, %v1775_v39 }
 0x2e8   :  { %v1334_v31 = vadd.f32 %v1332_v32, %v794_v22  ;;  %v1333_v34 = vmul.f32 %v1777_v27, %v1331_v5  ;;  %v772_v5 = vmul.f32 %v2108_v4, %v2460_v52 }
 0x2ea   :  { %1778 = vtanh.f32 %v1334_v31  ;;  %v1335_v23 = vadd.f32 %v1333_v34, %v805_v63  ;;  %v783_v63 = vmul.f32 %v2108_v4, %v648_v51  ;;  %v602_v51 = vcombine.high %v2253_v54, %v2253_v54 }
 0x2eb   :  { %1780 = vrcp.f32 %v1322_v28 }
 0x2ec   :  { %1782 = vtanh.f32 %v1335_v23  ;;  %v795_v23 = vadd.f32 %v2112_v16, %v772_v5  ;;  %v806_v57 = vadd.f32 %v2112_v16, %v783_v63  ;;  %v2506_v62 = vrot.slane %v602_v51, %v1943_v14 }
 0x2ed   :  { %1784 = vrcp.f32 %v1323_v35 }
 0x2f7   :  { %v1779_v38 = vpop.eup %1778 }
 0x2f8   :  { %v1781_v41 = vpop.eup %1780  ;;  %v1338_v43 = vsub.f32 %v2426_v37, %v1779_v38  ;;  %v703_v37 = vadd.f32 %v2034_v49, %v680_v45 }
 0x2f9   :  { %v1783_v42 = vpop.eup %1782 }
 0x2fa   :  { %v1340_v53 = vmul.f32 %v1781_v41, %v1338_v43  ;;  %v1339_v60 = vsub.f32 %v2436_v48, %v1783_v42  ;;  %v1785_v24 = vpop.eup %1784 }
 0x2fc   :  { %v2470_v50 = vadd.f32 %v1779_v38, %v1340_v53  ;;  %v1341_v0 = vmul.f32 %v1785_v24, %v1339_v60 }
 0x2fe   :  { %v1344_v40 = vmul.f32 %v2470_v50, %v2021_v44  ;;  %v1362_v6 = vmul.f32 %v2470_v50, %v2069_v11  ;;  %v2480_v7 = vadd.f32 %v1783_v42, %v1341_v0  ;;  %v1380_v32 = vmul.f32 %v2470_v50, %v2084_v29 }
 0x300   :  { %v1346_v48 = vadd.f32 %v1344_v40, %v703_v37  ;;  %v1364_v8 = vadd.f32 %v1362_v6, %v749_v1  ;;  %v1345_v10 = vmul.f32 %v2480_v7, %v2021_v44  ;;  %v1363_v19 = vmul.f32 %v2480_v7, %v2069_v11 }
 0x301   :  { %v1381_v27 = vmul.f32 %v2480_v7, %v2084_v29  ;;  %v1382_v31 = vadd.f32 %v1380_v32, %v2096_v47  ;;  %v632_v1 = vrot.slane %v2506_v62, %v1943_v14  ;;  %v681_v6 = vmul.f32 %v2029_v46, %v2045_v55 }
 0x302   :  { %v1348_v30 = vadd.f32 %v1346_v48, %v2047_v56  ;;  %v1347_v2 = vadd.f32 %v1345_v10, %v714_v9  ;;  %v1365_v13 = vadd.f32 %v1363_v19, %v760_v3  ;;  %v1366_v17 = vadd.f32 %v1364_v8, %v2102_v59 }
 0x303   :  { %v1383_v41 = vadd.f32 %v1381_v27, %v2096_v47  ;;  %v727_v48 = vmul.f32 %v2080_v26, %v2045_v55  ;;  %v692_v3 = vmul.f32 %v2029_v46, %v632_v1 }
 0x304   :  { %v1587_v15 = vmul.f32 -1.442695, %v1348_v30  ;;  %v1349_v25 = vadd.f32 %v1347_v2, %v2047_v56  ;;  %v1367_v18 = vadd.f32 %v1365_v13, %v2102_v59  ;;  %v1589_v12 = vmul.f32 -1.442695, %v1366_v17 }
 0x305   :  { %v738_v30 = vmul.f32 %v2080_v26, %v632_v1  ;;  %v750_v2 = vadd.f32 %v2090_v36, %v727_v48  ;;  %v715_v17 = vadd.f32 %v2034_v49, %v692_v3 }
 0x306   :  { %1786 = vpow2.f32 %v1587_v15  ;;  %v1588_v33 = vmul.f32 -1.442695, %v1349_v25  ;;  %v1590_v61 = vmul.f32 -1.442695, %v1367_v18 }
 0x308   :  { %1788 = vpow2.f32 %v1588_v33 }
 0x309   :  { %1790 = vpow2.f32 %v1589_v12  ;;  %v761_v12 = vadd.f32 %v2090_v36, %v738_v30 }
 0x313   :  { %v1787_v20 = vpop.eup %1786 }
 0x314   :  { %v1356_v21 = vadd.f32 1.0, %v1787_v20 }
 0x315   :  { %v1789_v39 = vpop.eup %1788 }
 0x316   :  { %1792 = vrcp.f32 %v1356_v21  ;;  %v1357_v22 = vadd.f32 1.0, %v1789_v39  ;;  %v1791_v28 = vpop.eup %1790 }
 0x317   :  { %1794 = vpow2.f32 %v1590_v61  ;;  %v1374_v42 = vadd.f32 1.0, %v1791_v28 }
 0x318   :  { %1796 = vrcp.f32 %v1357_v22 }
 0x323   :  { %v1793_v34 = vpop.eup %1792 }
 0x324   :  { %v1795_v35 = vpop.eup %1794  ;;  %v1384_v38 = vmul.f32 %v1793_v34, %v1382_v31 }
 0x325   :  { %v1797_v43 = vpop.eup %1796  ;;  %v1375_v60 = vadd.f32 1.0, %v1795_v35 }
 0x326   :  { %v1386_v45 = vadd.f32 %v1384_v38, %v795_v23  ;;  %v1385_v53 = vmul.f32 %v1797_v43, %v1383_v41  ;;  %v773_v43 = vmul.f32 %v2108_v4, %v2045_v55 }
 0x328   :  { %1798 = vtanh.f32 %v1386_v45  ;;  %v1387_v24 = vadd.f32 %v1385_v53, %v806_v57  ;;  %v784_v53 = vmul.f32 %v2108_v4, %v632_v1  ;;  %v796_v51 = vadd.f32 %v2112_v16, %v773_v43 }
 0x329   :  { %1800 = vrcp.f32 %v1374_v42  ;;  %v618_v1 = vcombine.high %v2506_v62, %v2506_v62 }
 0x32a   :  { %1802 = vtanh.f32 %v1387_v24  ;;  %v807_v55 = vadd.f32 %v2112_v16, %v784_v53 }
 0x32b   :  { %1804 = vrcp.f32 %v1375_v60  ;;  %v646_v30 = vrot.slane %v618_v1, %v1943_v14 }
 0x32d   :  { %v693_v62 = vmul.f32 %v2029_v46, %v646_v30  ;;  %v785_v53 = vmul.f32 %v2108_v4, %v646_v30 }
 0x335   :  { %v1799_v0 = vpop.eup %1798 }
 0x336   :  { %v1801_v37 = vpop.eup %1800  ;;  %v1390_v58 = vsub.f32 %v2470_v50, %v1799_v0  ;;  %v704_v50 = vadd.f32 %v2034_v49, %v681_v6 }
 0x337   :  { %v1803_v40 = vpop.eup %1802 }
 0x338   :  { %v1392_v8 = vmul.f32 %v1801_v37, %v1390_v58  ;;  %v1391_v54 = vsub.f32 %v2480_v7, %v1803_v40  ;;  %v1805_v9 = vpop.eup %1804 }
 0x33a   :  { %v2516_v10 = vadd.f32 %v1799_v0, %v1392_v8  ;;  %v1393_v19 = vmul.f32 %v1805_v9, %v1391_v54  ;;  %v598_v9 = vcombine.high %v2460_v52, %v2460_v52 }
 0x33c   :  { %v1396_v13 = vmul.f32 %v2516_v10, %v2021_v44  ;;  %v1414_v15 = vmul.f32 %v2516_v10, %v2069_v11  ;;  %v2526_v25 = vadd.f32 %v1803_v40, %v1393_v19  ;;  %v1432_v41 = vmul.f32 %v2516_v10, %v2084_v29 }
 0x33e   :  { %v1398_v7 = vadd.f32 %v1396_v13, %v704_v50  ;;  %v1416_v33 = vadd.f32 %v1414_v15, %v750_v2  ;;  %v1397_v18 = vmul.f32 %v2526_v25, %v2021_v44  ;;  %v1415_v20 = vmul.f32 %v2526_v25, %v2069_v11 }
 0x33f   :  { %v1433_v42 = vmul.f32 %v2526_v25, %v2084_v29  ;;  %v1434_v57 = vadd.f32 %v1432_v41, %v2096_v47  ;;  %v682_v13 = vmul.f32 %v2029_v46, %v598_v9  ;;  %v728_v15 = vmul.f32 %v2080_v26, %v598_v9 }
 0x340   :  { %v1400_v61 = vadd.f32 %v1398_v7, %v2047_v56  ;;  %v1399_v21 = vadd.f32 %v1397_v18, %v715_v17  ;;  %v1417_v39 = vadd.f32 %v1415_v20, %v761_v12  ;;  %v1418_v27 = vadd.f32 %v1416_v33, %v2102_v59 }
 0x341   :  { %v1435_v37 = vadd.f32 %v1433_v42, %v2096_v47  ;;  %v705_v12 = vadd.f32 %v2034_v49, %v682_v13  ;;  %v751_v20 = vadd.f32 %v2090_v36, %v728_v15  ;;  %v774_v42 = vmul.f32 %v2108_v4, %v598_v9 }
 0x342   :  { %v1591_v22 = vmul.f32 -1.442695, %v1400_v61  ;;  %v1401_v32 = vadd.f32 %v1399_v21, %v2047_v56  ;;  %v1419_v28 = vadd.f32 %v1417_v39, %v2102_v59  ;;  %v1593_v31 = vmul.f32 -1.442695, %v1418_v27 }
 0x344   :  { %1806 = vpow2.f32 %v1591_v22  ;;  %v1592_v5 = vmul.f32 -1.442695, %v1401_v32  ;;  %v1594_v34 = vmul.f32 -1.442695, %v1419_v28  ;;  %v716_v32 = vadd.f32 %v2034_v49, %v693_v62 }
 0x346   :  { %1808 = vpow2.f32 %v1592_v5 }
 0x347   :  { %1810 = vpow2.f32 %v1593_v31 }
 0x351   :  { %v1807_v63 = vpop.eup %1806 }
 0x352   :  { %v1408_v35 = vadd.f32 1.0, %v1807_v63 }
 0x353   :  { %v1809_v23 = vpop.eup %1808 }
 0x354   :  { %1812 = vrcp.f32 %v1408_v35  ;;  %v1409_v38 = vadd.f32 1.0, %v1809_v23  ;;  %v1811_v45 = vpop.eup %1810 }
 0x355   :  { %1814 = vpow2.f32 %v1594_v34  ;;  %v1426_v40 = vadd.f32 1.0, %v1811_v45 }
 0x356   :  { %1816 = vrcp.f32 %v1409_v38 }
 0x361   :  { %v1813_v60 = vpop.eup %1812 }
 0x362   :  { %v1815_v24 = vpop.eup %1814  ;;  %v1436_v0 = vmul.f32 %v1813_v60, %v1434_v57 }
 0x363   :  { %v1817_v58 = vpop.eup %1816  ;;  %v1427_v8 = vadd.f32 1.0, %v1815_v24 }
 0x364   :  { %v1438_v6 = vadd.f32 %v1436_v0, %v796_v51  ;;  %v1437_v48 = vmul.f32 %v1817_v58, %v1435_v37  ;;  %v797_v51 = vadd.f32 %v2112_v16, %v774_v42 }
 0x366   :  { %1818 = vtanh.f32 %v1438_v6  ;;  %v1439_v54 = vadd.f32 %v1437_v48, %v807_v55  ;;  %v808_v55 = vadd.f32 %v2112_v16, %v785_v53 }
 0x367   :  { %1820 = vrcp.f32 %v1426_v40 }
 0x368   :  { %1822 = vtanh.f32 %v1439_v54 }
 0x369   :  { %1824 = vrcp.f32 %v1427_v8 }
 0x373   :  { %v1819_v3 = vpop.eup %1818 }
 0x374   :  { %v1821_v19 = vpop.eup %1820  ;;  %v1442_v50 = vsub.f32 %v2516_v10, %v1819_v3  ;;  %v739_v10 = vmul.f32 %v2080_v26, %v646_v30 }
 0x375   :  { %v1823_v2 = vpop.eup %1822 }
 0x376   :  { %v1444_v7 = vmul.f32 %v1821_v19, %v1442_v50  ;;  %v1443_v33 = vsub.f32 %v2526_v25, %v1823_v2  ;;  %v1825_v17 = vpop.eup %1824  ;;  %v762_v5 = vadd.f32 %v2090_v36, %v739_v10 }
 0x378   :  { %v2558_v18 = vadd.f32 %v1819_v3, %v1444_v7  ;;  %v1445_v52 = vmul.f32 %v1825_v17, %v1443_v33 }
 0x37a   :  { %v1448_v61 = vmul.f32 %v2558_v18, %v2021_v44  ;;  %v1466_v21 = vmul.f32 %v2558_v18, %v2069_v11  ;;  %v1447_v39 = vadd.f32 %v1823_v2, %v1445_v52 }
 0x37c   :  { %v1450_v25 = vadd.f32 %v1448_v61, %v705_v12  ;;  %v1468_v22 = vadd.f32 %v1466_v21, %v751_v20  ;;  %v1449_v46 = vmul.f32 %v1447_v39, %v2021_v44  ;;  %v1467_v27 = vmul.f32 %v1447_v39, %v2069_v11 }
 0x37d   :  { %v1485_v45 = vmul.f32 %v1447_v39, %v2084_v29 }
 0x37e   :  { %v1452_v26 = vadd.f32 %v1450_v25, %v2047_v56  ;;  %v1451_v28 = vadd.f32 %v1449_v46, %v716_v32  ;;  %v1469_v31 = vadd.f32 %v1467_v27, %v762_v5  ;;  %v1470_v23 = vadd.f32 %v1468_v22, %v2102_v59 }
 0x37f   :  { %v1487_v37 = vadd.f32 %v1485_v45, %v2096_v47 }
 0x380   :  { %v1595_v63 = vmul.f32 -1.442695, %v1452_v26  ;;  %v1453_v34 = vadd.f32 %v1451_v28, %v2047_v56  ;;  %v1471_v49 = vadd.f32 %v1469_v31, %v2102_v59  ;;  %v1597_v38 = vmul.f32 -1.442695, %v1470_v23 }
 0x381   :  { %v1484_v56 = vmul.f32 %v2558_v18, %v2084_v29 }
 0x382   :  { %1826 = vpow2.f32 %v1595_v63  ;;  %v1596_v35 = vmul.f32 -1.442695, %v1453_v34  ;;  %v1598_v41 = vmul.f32 -1.442695, %v1471_v49 }
 0x383   :  { %v1486_v59 = vadd.f32 %v1484_v56, %v2096_v47 }
 0x384   :  { %1828 = vpow2.f32 %v1596_v35 }
 0x385   :  { %1830 = vpow2.f32 %v1597_v38 }
 0x38f   :  { %v1827_v44 = vpop.eup %1826 }
 0x390   :  { %v1460_v36 = vadd.f32 1.0, %v1827_v44 }
 0x391   :  { %v1829_v43 = vpop.eup %1828 }
 0x392   :  { %1832 = vrcp.f32 %v1460_v36  ;;  %v1461_v11 = vadd.f32 1.0, %v1829_v43  ;;  %v1831_v57 = vpop.eup %1830 }
 0x393   :  { %1834 = vpow2.f32 %v1598_v41  ;;  %v1478_v40 = vadd.f32 1.0, %v1831_v57 }
 0x394   :  { %1836 = vrcp.f32 %v1461_v11 }
 0x39f   :  { %v1833_v60 = vpop.eup %1832 }
 0x3a0   :  { %v1835_v24 = vpop.eup %1834  ;;  %v1488_v0 = vmul.f32 %v1833_v60, %v1486_v59 }
 0x3a1   :  { %v1837_v58 = vpop.eup %1836  ;;  %v1479_v29 = vadd.f32 1.0, %v1835_v24 }
 0x3a2   :  { %v1490_v6 = vadd.f32 %v1488_v0, %v797_v51  ;;  %v1489_v48 = vmul.f32 %v1837_v58, %v1487_v37 }
 0x3a4   :  { %1838 = vtanh.f32 %v1490_v6  ;;  %v1491_v8 = vadd.f32 %v1489_v48, %v808_v55 }
 0x3a5   :  { %1840 = vrcp.f32 %v1478_v40 }
 0x3a6   :  { %1842 = vtanh.f32 %v1491_v8 }
 0x3a7   :  { %1844 = vrcp.f32 %v1479_v29 }
 0x3b1   :  { %v1839_v4 = vpop.eup %1838 }
 0x3b2   :  { %v1841_v54 = vpop.eup %1840  ;;  %v1494_v1 = vsub.f32 %v2558_v18, %v1839_v4 }
 0x3b3   :  { %v1843_v9 = vpop.eup %1842 }
 0x3b4   :  { %v1495_v3 = vsub.f32 %v1447_v39, %v1843_v9  ;;  %v1496_v19 = vmul.f32 %v1841_v54, %v1494_v1  ;;  %v1845_v47 = vpop.eup %1844 }
 0x3b6   :  { %v1497_v50 = vmul.f32 %v1845_v47, %v1495_v3  ;;  %v1498_v30 = vadd.f32 %v1839_v4, %v1496_v19 }
 0x3b8   :  { %v1499_v2 = vadd.f32 %v1843_v9, %v1497_v50 }
 0x3ba   :  { %v1502_v13 = vcombine.low %v1498_v30, %v1499_v2 }
 0x3bc   :  { %v1509_v16 = vrot.slane %v1502_v13, %v1943_v14 }
 0x3be   :  { %v1516_v15 = vrot.slane %v1509_v16, %v1943_v14 }
 0x3c0   :  { %1519 = vst.msk [vmem:[#allocation5] sm:$0x3] %vm1518_vm3, %v1516_v15 }
 0x3c1   :  { %1869 = shalt.err (!%p1866_p9)
}
 0x3c2   :  { %1529 = dma.vmem_to_hbm [thread:$0]  %s1527_s25, 32, %s2596_s5, [#allocation3]  }
 0x3c3   :  { %1880 = dma.done.wait [#allocation3], 32  }
 0x3c4   :  { %1881 = vsyncadd [#allocation3], 4294967264 }
 0x3c5   :  { %1533 = vsyncpa [#allocation3], 1 }
 0x3c6   :  { %1534 = vsyncpa [#allocation4], 1 }

</bundles_post_ra>
